<compile_context>
chip_gen: v5e
topology: v5e:2x2
jax: 0.10.0
libtpu: 0.0.40
codegen_flags: <defaults>
</compile_context>

<pallas_src>
import functools

import jax
import jax.numpy as jnp
from jax.experimental import pallas as pl
from jax.experimental.pallas import tpu as pltpu


def _make_rdb_kernel(nf, gc, H, W, compute_dtype):
    HW = H * W
    cins = [nf, nf + gc, nf + 2 * gc, nf + 3 * gc, nf + 4 * gc]
    couts = [gc, gc, gc, gc, nf]

    # Static lane-roll amounts for the 9 taps on the row-major flattened
    # spatial axis (t = dy*3 + dx; output pixel p reads input p + oy*W + ox,
    # wrap-around positions are zeroed by the precomputed masks).
    shifts = [(-((dy - 1) * W + (dx - 1))) % HW
              for dy in range(3) for dx in range(3)]
    center = 4  # dy=dx=1 -> shift 0, mask is all-ones

    def kernel(x_ref, masks_ref, w1, b1, w2, b2, w3, b3, w4, b4, w5, b5,
               o_ref, cache):
        ws = [w1, w2, w3, w4, w5]
        bs = [b1, b2, b3, b4, b5]

        x = x_ref[0]                                   # (nf, HW), original dtype

        def write_taps(vals, row_off, sz):
            # vals: (sz, HW) in compute_dtype.  Write the 9 rolled+masked
            # copies once; every later conv just slices the cache (no concat,
            # no per-conv re-rolling).  All stores are contiguous row blocks.
            for t in range(9):
                if t == center:
                    r = vals
                else:
                    r = pltpu.roll(vals, shifts[t], axis=1) * masks_ref[t:t + 1, :]
                cache[row_off + t * sz: row_off + (t + 1) * sz, :] = r

        # Group 0 = the input x.
        write_taps(x.astype(compute_dtype), 0, nf)

        for k in range(5):
            cin, cout = cins[k], couts[k]
            # Dense "concat" == one contiguous slice of the persistent cache.
            rhs = cache[0:9 * cin, :]                  # (9*cin, HW)
            # One fat-K MXU matmul: (cout, 9*cin) @ (9*cin, HW) -> (cout, HW).
            acc = jnp.dot(ws[k][...], rhs, preferred_element_type=jnp.float32)
            acc = acc + bs[k][...]                     # bias (cout, 1), f32
            if k < 4:
                act = jnp.where(acc >= 0, acc, 0.2 * acc)   # LeakyReLU(0.2) in f32
                write_taps(act.astype(compute_dtype), 9 * cin, gc)
            else:
                res = x.astype(jnp.float32)            # residual from the f32 input block
                o_ref[0] = (acc * 0.2 + res).astype(o_ref.dtype)

    return kernel


def _reorder_weight(w, nf, gc):
    """(3,3,cin,cout) HWIO -> (cout, 9*cin) with the K axis ordered
    group-major (x, x1, x2, ...), tap-major within group, channel-minor —
    matching the in-kernel shifted-tap cache row order."""
    cin, cout = w.shape[2], w.shape[3]
    bounds = [0, nf]
    while bounds[-1] < cin:
        bounds.append(bounds[-1] + gc)
    blocks = []
    for c0, c1 in zip(bounds[:-1], bounds[1:]):
        wg = jnp.transpose(w[:, :, c0:c1, :], (3, 0, 1, 2))   # (cout, 3, 3, sz)
        blocks.append(wg.reshape(cout, 9 * (c1 - c0)))
    return jnp.concatenate(blocks, axis=1)


def residual_dense_block_5c(x_nchw, params, *, compute_dtype=jnp.bfloat16):
    """Forward pass equivalent to ResidualDenseBlock_5C.forward (NCHW in/out).

    compute_dtype controls activations/weights/tap-cache precision; the
    accumulator, bias, LeakyReLU and residual add are always f32.
    """
    N, nf, H, W = x_nchw.shape
    gc = params[0][0].shape[-1]
    HW = H * W
    Ctot = nf + 4 * gc

    # NCHW -> (N, C, H*W): pure reshape, spatial lands on the 128-lane axis.
    # Keep the original dtype so the residual stays full precision in-kernel.
    x_flat = x_nchw.reshape(N, nf, HW)

    # Hoisted per-tap image-border masks (9, HW) — computed once on the host
    # instead of iota + //W + %W every grid step.
    pos = jnp.arange(HW, dtype=jnp.int32)
    hh, ww = pos // W, pos % W
    mask_rows = []
    for dy in range(3):
        for dx in range(3):
            oy, ox = dy - 1, dx - 1
            valid = ((hh + oy >= 0) & (hh + oy < H)
                     & (ww + ox >= 0) & (ww + ox < W))
            mask_rows.append(valid)
    masks = jnp.stack(mask_rows, axis=0).astype(compute_dtype)      # (9, HW)

    args = [x_flat, masks]
    in_specs = [pl.BlockSpec((1, nf, HW), lambda n: (n, 0, 0)),
                pl.BlockSpec((9, HW), lambda n: (0, 0))]
    for (w, b) in params:
        cin, cout = w.shape[2], w.shape[3]
        wr = _reorder_weight(w, nf, gc).astype(compute_dtype)       # (cout, 9*cin)
        br = b.reshape(cout, 1).astype(jnp.float32)
        args += [wr, br]
        in_specs += [pl.BlockSpec((cout, 9 * cin), lambda n: (0, 0)),
                     pl.BlockSpec((cout, 1), lambda n: (0, 0))]

    kernel = _make_rdb_kernel(nf, gc, H, W, compute_dtype)

    # Explicit VMEM budget: tap cache + double-buffered IO blocks + headroom,
    # capped at v7x's 64 MiB physical VMEM.
    it = jnp.dtype(compute_dtype).itemsize
    xt = jnp.dtype(x_nchw.dtype).itemsize
    cache_bytes = 9 * Ctot * HW * it
    io_bytes = 2 * (2 * nf * HW * xt + 9 * HW * it
                    + sum(w.size * it + b.size * 4 for (w, b) in params))
    vmem_limit = int(min(64 * 1024 * 1024,
                         max(cache_bytes + io_bytes + (8 << 20),
                             32 * 1024 * 1024)))

    out = pl.pallas_call(
        kernel,
        out_shape=jax.ShapeDtypeStruct((N, nf, HW), x_nchw.dtype),
        grid_spec=pltpu.PrefetchScalarGridSpec(
            num_scalar_prefetch=0,
            grid=(N,),
            in_specs=in_specs,
            out_specs=pl.BlockSpec((1, nf, HW), lambda n: (n, 0, 0)),
            scratch_shapes=[pltpu.VMEM((9 * Ctot, HW), compute_dtype)],
        ),
        compiler_params=pltpu.CompilerParams(
            dimension_semantics=("parallel",),
            vmem_limit_bytes=vmem_limit,
        ),
    )(*args)
    return out.reshape(N, nf, H, W)


def init_rdb_params(key, nf, gc, scale=0.1, dtype=jnp.float32):
    """Deterministic kaiming_normal_(a=0, mode='fan_in') * scale, zero bias."""
    cins = [nf, nf + gc, nf + 2 * gc, nf + 3 * gc, nf + 4 * gc]
    couts = [gc, gc, gc, gc, nf]
    params = []
    keys = jax.random.split(key, 5)
    for k, cin, cout in zip(keys, cins, couts):
        fan_in = cin * 3 * 3
        std = (2.0 / fan_in) ** 0.5
        w = jax.random.normal(k, (3, 3, cin, cout), dtype) * std * scale  # HWIO
        b = jnp.zeros((cout,), dtype)
        params.append((w, b))
    return params


def _reference_rdb(x_nchw, params):
    """Pure-JAX reference (lax.conv) for correctness check."""
    def conv(x, w, b):
        w_oihw = jnp.transpose(w, (3, 2, 0, 1))
        y = jax.lax.conv_general_dilated(
            x, w_oihw, window_strides=(1, 1), padding=((1, 1), (1, 1)),
            dimension_numbers=("NCHW", "OIHW", "NCHW"),
        )
        return y + b[None, :, None, None]

    def lrelu(v):
        return jnp.where(v >= 0, v, 0.2 * v)

    (w1, b1), (w2, b2), (w3, b3), (w4, b4), (w5, b5) = params
    x = x_nchw
    x1 = lrelu(conv(x, w1, b1))
    x2 = lrelu(conv(jnp.concatenate([x, x1], 1), w2, b2))
    x3 = lrelu(conv(jnp.concatenate([x, x1, x2], 1), w3, b3))
    x4 = lrelu(conv(jnp.concatenate([x, x1, x2, x3], 1), w4, b4))
    x5 = conv(jnp.concatenate([x, x1, x2, x3, x4], 1), w5, b5)
    return x5 * 0.2 + x


if __name__ == "__main__":
    key = jax.random.PRNGKey(0)
    k_x, k_p = jax.random.split(key)

    # Small shapes consistent with the module: nf=16, gc=8, batch=2, 16x16.
    N, nf, gc, H, W = 2, 16, 8, 16, 16
    x = jax.random.normal(k_x, (N, nf, H, W), jnp.float32)
    params = init_rdb_params(k_p, nf, gc, scale=0.1)

    ref = _reference_rdb(x, params)

    # f32 compute path: tight numerical check against the lax.conv reference.
    fwd_f32 = jax.jit(functools.partial(residual_dense_block_5c, params=params,
                                        compute_dtype=jnp.float32))
    out_f32 = jax.block_until_ready(fwd_f32(x))
    assert out_f32.shape == (N, nf, H, W)
    assert jnp.allclose(out_f32, ref, atol=1e-4, rtol=1e-4)

    # Default bf16 compute path (residual/accumulation stay f32): loose check.
    fwd_bf16 = jax.jit(functools.partial(residual_dense_block_5c, params=params))
    out_bf16 = jax.block_until_ready(fwd_bf16(x))
    assert out_bf16.shape == (N, nf, H, W)
    assert jnp.allclose(out_bf16, ref, atol=1e-2, rtol=1e-2)

    print("KERNEL_OK")
</pallas_src>

<mosaic_0001>
module attributes {stable_mosaic.version = 11 : i64} {
  func.func @kernel(%arg0: i32, %arg1: memref<1x16x256xf32, #tpu.memory_space<vmem>>, %arg2: memref<9x256xf32, #tpu.memory_space<vmem>>, %arg3: memref<8x144xf32, #tpu.memory_space<vmem>>, %arg4: memref<8x1xf32, #tpu.memory_space<vmem>>, %arg5: memref<8x216xf32, #tpu.memory_space<vmem>>, %arg6: memref<8x1xf32, #tpu.memory_space<vmem>>, %arg7: memref<8x288xf32, #tpu.memory_space<vmem>>, %arg8: memref<8x1xf32, #tpu.memory_space<vmem>>, %arg9: memref<8x360xf32, #tpu.memory_space<vmem>>, %arg10: memref<8x1xf32, #tpu.memory_space<vmem>>, %arg11: memref<16x432xf32, #tpu.memory_space<vmem>>, %arg12: memref<16x1xf32, #tpu.memory_space<vmem>>, %arg13: memref<1x16x256xf32, #tpu.memory_space<vmem>>, %arg14: memref<432x256xf32, #tpu.memory_space<vmem>>) attributes {dimension_semantics = [#tpu.dimension_semantics<parallel>], iteration_bounds = array<i64: 2>, scalar_prefetch = 0 : i64, scratch_operands = 1 : i64, tpu.core_type = #tpu.core_type<tc>, window_params = [{transform_indices = @transform_0, window_bounds = array<i64: 1, 16, 256>}, {pipeline_mode = #tpu.pipeline_mode<synchronous>, transform_indices = @transform_1, window_bounds = array<i64: 9, 256>}, {pipeline_mode = #tpu.pipeline_mode<synchronous>, transform_indices = @transform_2, window_bounds = array<i64: 8, 144>}, {pipeline_mode = #tpu.pipeline_mode<synchronous>, transform_indices = @transform_3, window_bounds = array<i64: 8, 1>}, {pipeline_mode = #tpu.pipeline_mode<synchronous>, transform_indices = @transform_4, window_bounds = array<i64: 8, 216>}, {pipeline_mode = #tpu.pipeline_mode<synchronous>, transform_indices = @transform_5, window_bounds = array<i64: 8, 1>}, {pipeline_mode = #tpu.pipeline_mode<synchronous>, transform_indices = @transform_6, window_bounds = array<i64: 8, 288>}, {pipeline_mode = #tpu.pipeline_mode<synchronous>, transform_indices = @transform_7, window_bounds = array<i64: 8, 1>}, {pipeline_mode = #tpu.pipeline_mode<synchronous>, transform_indices = @transform_8, window_bounds = array<i64: 8, 360>}, {pipeline_mode = #tpu.pipeline_mode<synchronous>, transform_indices = @transform_9, window_bounds = array<i64: 8, 1>}, {pipeline_mode = #tpu.pipeline_mode<synchronous>, transform_indices = @transform_10, window_bounds = array<i64: 16, 432>}, {pipeline_mode = #tpu.pipeline_mode<synchronous>, transform_indices = @transform_11, window_bounds = array<i64: 16, 1>}, {transform_indices = @transform_12, window_bounds = array<i64: 1, 16, 256>}]} {
    %c0 = arith.constant 0 : index
    %c0_0 = arith.constant 0 : index
    %c0_1 = arith.constant 0 : index
    %0 = vector.load %arg1[%c0, %c0_0, %c0_1] : memref<1x16x256xf32, #tpu.memory_space<vmem>>, vector<1x16x256xf32>
    %1 = vector.shape_cast %0 : vector<1x16x256xf32> to vector<16x256xf32>
    %c17_i32 = arith.constant 17 : i32
    %2 = tpu.dynamic_rotate %1 by %c17_i32 dim 1 : vector<16x256xf32>, i32 -> vector<16x256xf32>
    %c0_2 = arith.constant 0 : index
    %c0_3 = arith.constant 0 : index
    %3 = vector.load %arg2[%c0_2, %c0_3] : memref<9x256xf32, #tpu.memory_space<vmem>>, vector<1x256xf32>
    %4 = vector.broadcast %3 : vector<1x256xf32> to vector<16x256xf32>
    %5 = arith.mulf %2, %4 : vector<16x256xf32>
    %c0_4 = arith.constant 0 : index
    %c0_5 = arith.constant 0 : index
    %6 = vector.load %arg14[%c0_4, %c0_5] : memref<432x256xf32, #tpu.memory_space<vmem>>, vector<16x256xf32>
    tpu.vector_store %arg14[%c0_4, %c0_5], %5 {strides = array<i32>} : memref<432x256xf32, #tpu.memory_space<vmem>>, vector<16x256xf32>,
    %c16_i32 = arith.constant 16 : i32
    %7 = tpu.dynamic_rotate %1 by %c16_i32 dim 1 : vector<16x256xf32>, i32 -> vector<16x256xf32>
    %c1 = arith.constant 1 : index
    %c0_6 = arith.constant 0 : index
    %8 = vector.load %arg2[%c1, %c0_6] : memref<9x256xf32, #tpu.memory_space<vmem>>, vector<1x256xf32>
    %9 = vector.broadcast %8 : vector<1x256xf32> to vector<16x256xf32>
    %10 = arith.mulf %7, %9 : vector<16x256xf32>
    %c16 = arith.constant 16 : index
    %c0_7 = arith.constant 0 : index
    %11 = vector.load %arg14[%c16, %c0_7] : memref<432x256xf32, #tpu.memory_space<vmem>>, vector<16x256xf32>
    tpu.vector_store %arg14[%c16, %c0_7], %10 {strides = array<i32>} : memref<432x256xf32, #tpu.memory_space<vmem>>, vector<16x256xf32>,
    %c15_i32 = arith.constant 15 : i32
    %12 = tpu.dynamic_rotate %1 by %c15_i32 dim 1 : vector<16x256xf32>, i32 -> vector<16x256xf32>
    %c2 = arith.constant 2 : index
    %c0_8 = arith.constant 0 : index
    %13 = vector.load %arg2[%c2, %c0_8] : memref<9x256xf32, #tpu.memory_space<vmem>>, vector<1x256xf32>
    %14 = vector.broadcast %13 : vector<1x256xf32> to vector<16x256xf32>
    %15 = arith.mulf %12, %14 : vector<16x256xf32>
    %c32 = arith.constant 32 : index
    %c0_9 = arith.constant 0 : index
    %16 = vector.load %arg14[%c32, %c0_9] : memref<432x256xf32, #tpu.memory_space<vmem>>, vector<16x256xf32>
    tpu.vector_store %arg14[%c32, %c0_9], %15 {strides = array<i32>} : memref<432x256xf32, #tpu.memory_space<vmem>>, vector<16x256xf32>,
    %c1_i32 = arith.constant 1 : i32
    %17 = tpu.dynamic_rotate %1 by %c1_i32 dim 1 : vector<16x256xf32>, i32 -> vector<16x256xf32>
    %c3 = arith.constant 3 : index
    %c0_10 = arith.constant 0 : index
    %18 = vector.load %arg2[%c3, %c0_10] : memref<9x256xf32, #tpu.memory_space<vmem>>, vector<1x256xf32>
    %19 = vector.broadcast %18 : vector<1x256xf32> to vector<16x256xf32>
    %20 = arith.mulf %17, %19 : vector<16x256xf32>
    %c48 = arith.constant 48 : index
    %c0_11 = arith.constant 0 : index
    %21 = vector.load %arg14[%c48, %c0_11] : memref<432x256xf32, #tpu.memory_space<vmem>>, vector<16x256xf32>
    tpu.vector_store %arg14[%c48, %c0_11], %20 {strides = array<i32>} : memref<432x256xf32, #tpu.memory_space<vmem>>, vector<16x256xf32>,
    %c64 = arith.constant 64 : index
    %c0_12 = arith.constant 0 : index
    %22 = vector.load %arg14[%c64, %c0_12] : memref<432x256xf32, #tpu.memory_space<vmem>>, vector<16x256xf32>
    tpu.vector_store %arg14[%c64, %c0_12], %1 {strides = array<i32>} : memref<432x256xf32, #tpu.memory_space<vmem>>, vector<16x256xf32>,
    %c255_i32 = arith.constant 255 : i32
    %23 = tpu.dynamic_rotate %1 by %c255_i32 dim 1 : vector<16x256xf32>, i32 -> vector<16x256xf32>
    %c5 = arith.constant 5 : index
    %c0_13 = arith.constant 0 : index
    %24 = vector.load %arg2[%c5, %c0_13] : memref<9x256xf32, #tpu.memory_space<vmem>>, vector<1x256xf32>
    %25 = vector.broadcast %24 : vector<1x256xf32> to vector<16x256xf32>
    %26 = arith.mulf %23, %25 : vector<16x256xf32>
    %c80 = arith.constant 80 : index
    %c0_14 = arith.constant 0 : index
    %27 = vector.load %arg14[%c80, %c0_14] : memref<432x256xf32, #tpu.memory_space<vmem>>, vector<16x256xf32>
    tpu.vector_store %arg14[%c80, %c0_14], %26 {strides = array<i32>} : memref<432x256xf32, #tpu.memory_space<vmem>>, vector<16x256xf32>,
    %c241_i32 = arith.constant 241 : i32
    %28 = tpu.dynamic_rotate %1 by %c241_i32 dim 1 : vector<16x256xf32>, i32 -> vector<16x256xf32>
    %c6 = arith.constant 6 : index
    %c0_15 = arith.constant 0 : index
    %29 = vector.load %arg2[%c6, %c0_15] : memref<9x256xf32, #tpu.memory_space<vmem>>, vector<1x256xf32>
    %30 = vector.broadcast %29 : vector<1x256xf32> to vector<16x256xf32>
    %31 = arith.mulf %28, %30 : vector<16x256xf32>
    %c96 = arith.constant 96 : index
    %c0_16 = arith.constant 0 : index
    %32 = vector.load %arg14[%c96, %c0_16] : memref<432x256xf32, #tpu.memory_space<vmem>>, vector<16x256xf32>
    tpu.vector_store %arg14[%c96, %c0_16], %31 {strides = array<i32>} : memref<432x256xf32, #tpu.memory_space<vmem>>, vector<16x256xf32>,
    %c240_i32 = arith.constant 240 : i32
    %33 = tpu.dynamic_rotate %1 by %c240_i32 dim 1 : vector<16x256xf32>, i32 -> vector<16x256xf32>
    %c7 = arith.constant 7 : index
    %c0_17 = arith.constant 0 : index
    %34 = vector.load %arg2[%c7, %c0_17] : memref<9x256xf32, #tpu.memory_space<vmem>>, vector<1x256xf32>
    %35 = vector.broadcast %34 : vector<1x256xf32> to vector<16x256xf32>
    %36 = arith.mulf %33, %35 : vector<16x256xf32>
    %c112 = arith.constant 112 : index
    %c0_18 = arith.constant 0 : index
    %37 = vector.load %arg14[%c112, %c0_18] : memref<432x256xf32, #tpu.memory_space<vmem>>, vector<16x256xf32>
    tpu.vector_store %arg14[%c112, %c0_18], %36 {strides = array<i32>} : memref<432x256xf32, #tpu.memory_space<vmem>>, vector<16x256xf32>,
    %c239_i32 = arith.constant 239 : i32
    %38 = tpu.dynamic_rotate %1 by %c239_i32 dim 1 : vector<16x256xf32>, i32 -> vector<16x256xf32>
    %c8 = arith.constant 8 : index
    %c0_19 = arith.constant 0 : index
    %39 = vector.load %arg2[%c8, %c0_19] : memref<9x256xf32, #tpu.memory_space<vmem>>, vector<1x256xf32>
    %40 = vector.broadcast %39 : vector<1x256xf32> to vector<16x256xf32>
    %41 = arith.mulf %38, %40 : vector<16x256xf32>
    %c128 = arith.constant 128 : index
    %c0_20 = arith.constant 0 : index
    %42 = vector.load %arg14[%c128, %c0_20] : memref<432x256xf32, #tpu.memory_space<vmem>>, vector<16x256xf32>
    tpu.vector_store %arg14[%c128, %c0_20], %41 {strides = array<i32>} : memref<432x256xf32, #tpu.memory_space<vmem>>, vector<16x256xf32>,
    %c0_21 = arith.constant 0 : index
    %c0_22 = arith.constant 0 : index
    %43 = vector.load %arg14[%c0_21, %c0_22] : memref<432x256xf32, #tpu.memory_space<vmem>>, vector<144x256xf32>
    %c0_23 = arith.constant 0 : index
    %c0_24 = arith.constant 0 : index
    %44 = vector.load %arg3[%c0_23, %c0_24] : memref<8x144xf32, #tpu.memory_space<vmem>>, vector<8x144xf32>
    %cst = arith.constant dense<0.000000e+00> : vector<8x256xf32>
    %45 = tpu.matmul %44, %43, %cst {dimension_numbers = #tpu.dot_dimension_numbers<[1], [0], [0], [1], [0, 0, 1, 1], [], []>} : vector<8x144xf32>, vector<144x256xf32>, vector<8x256xf32> -> vector<8x256xf32>
    %c0_25 = arith.constant 0 : index
    %c0_26 = arith.constant 0 : index
    %46 = vector.load %arg4[%c0_25, %c0_26] : memref<8x1xf32, #tpu.memory_space<vmem>>, vector<8x1xf32>
    %47 = vector.broadcast %46 : vector<8x1xf32> to vector<8x256xf32>
    %48 = arith.addf %45, %47 : vector<8x256xf32>
    %cst_27 = arith.constant 0.000000e+00 : f32
    %49 = vector.broadcast %cst_27 : f32 to vector<8x256xf32>
    %50 = arith.cmpf oge, %48, %49 : vector<8x256xf32>
    %cst_28 = arith.constant 2.000000e-01 : f32
    %51 = vector.broadcast %cst_28 : f32 to vector<8x256xf32>
    %52 = arith.mulf %51, %48 : vector<8x256xf32>
    %53 = arith.select %50, %48, %52 : vector<8x256xi1>, vector<8x256xf32>
    %c17_i32_29 = arith.constant 17 : i32
    %54 = tpu.dynamic_rotate %53 by %c17_i32_29 dim 1 : vector<8x256xf32>, i32 -> vector<8x256xf32>
    %c0_30 = arith.constant 0 : index
    %c0_31 = arith.constant 0 : index
    %55 = vector.load %arg2[%c0_30, %c0_31] : memref<9x256xf32, #tpu.memory_space<vmem>>, vector<1x256xf32>
    %56 = vector.broadcast %55 : vector<1x256xf32> to vector<8x256xf32>
    %57 = arith.mulf %54, %56 : vector<8x256xf32>
    %c144 = arith.constant 144 : index
    %c0_32 = arith.constant 0 : index
    %58 = vector.load %arg14[%c144, %c0_32] : memref<432x256xf32, #tpu.memory_space<vmem>>, vector<8x256xf32>
    tpu.vector_store %arg14[%c144, %c0_32], %57 {strides = array<i32>} : memref<432x256xf32, #tpu.memory_space<vmem>>, vector<8x256xf32>,
    %c16_i32_33 = arith.constant 16 : i32
    %59 = tpu.dynamic_rotate %53 by %c16_i32_33 dim 1 : vector<8x256xf32>, i32 -> vector<8x256xf32>
    %c1_34 = arith.constant 1 : index
    %c0_35 = arith.constant 0 : index
    %60 = vector.load %arg2[%c1_34, %c0_35] : memref<9x256xf32, #tpu.memory_space<vmem>>, vector<1x256xf32>
    %61 = vector.broadcast %60 : vector<1x256xf32> to vector<8x256xf32>
    %62 = arith.mulf %59, %61 : vector<8x256xf32>
    %c152 = arith.constant 152 : index
    %c0_36 = arith.constant 0 : index
    %63 = vector.load %arg14[%c152, %c0_36] : memref<432x256xf32, #tpu.memory_space<vmem>>, vector<8x256xf32>
    tpu.vector_store %arg14[%c152, %c0_36], %62 {strides = array<i32>} : memref<432x256xf32, #tpu.memory_space<vmem>>, vector<8x256xf32>,
    %c15_i32_37 = arith.constant 15 : i32
    %64 = tpu.dynamic_rotate %53 by %c15_i32_37 dim 1 : vector<8x256xf32>, i32 -> vector<8x256xf32>
    %c2_38 = arith.constant 2 : index
    %c0_39 = arith.constant 0 : index
    %65 = vector.load %arg2[%c2_38, %c0_39] : memref<9x256xf32, #tpu.memory_space<vmem>>, vector<1x256xf32>
    %66 = vector.broadcast %65 : vector<1x256xf32> to vector<8x256xf32>
    %67 = arith.mulf %64, %66 : vector<8x256xf32>
    %c160 = arith.constant 160 : index
    %c0_40 = arith.constant 0 : index
    %68 = vector.load %arg14[%c160, %c0_40] : memref<432x256xf32, #tpu.memory_space<vmem>>, vector<8x256xf32>
    tpu.vector_store %arg14[%c160, %c0_40], %67 {strides = array<i32>} : memref<432x256xf32, #tpu.memory_space<vmem>>, vector<8x256xf32>,
    %c1_i32_41 = arith.constant 1 : i32
    %69 = tpu.dynamic_rotate %53 by %c1_i32_41 dim 1 : vector<8x256xf32>, i32 -> vector<8x256xf32>
    %c3_42 = arith.constant 3 : index
    %c0_43 = arith.constant 0 : index
    %70 = vector.load %arg2[%c3_42, %c0_43] : memref<9x256xf32, #tpu.memory_space<vmem>>, vector<1x256xf32>
    %71 = vector.broadcast %70 : vector<1x256xf32> to vector<8x256xf32>
    %72 = arith.mulf %69, %71 : vector<8x256xf32>
    %c168 = arith.constant 168 : index
    %c0_44 = arith.constant 0 : index
    %73 = vector.load %arg14[%c168, %c0_44] : memref<432x256xf32, #tpu.memory_space<vmem>>, vector<8x256xf32>
    tpu.vector_store %arg14[%c168, %c0_44], %72 {strides = array<i32>} : memref<432x256xf32, #tpu.memory_space<vmem>>, vector<8x256xf32>,
    %c176 = arith.constant 176 : index
    %c0_45 = arith.constant 0 : index
    %74 = vector.load %arg14[%c176, %c0_45] : memref<432x256xf32, #tpu.memory_space<vmem>>, vector<8x256xf32>
    tpu.vector_store %arg14[%c176, %c0_45], %53 {strides = array<i32>} : memref<432x256xf32, #tpu.memory_space<vmem>>, vector<8x256xf32>,
    %c255_i32_46 = arith.constant 255 : i32
    %75 = tpu.dynamic_rotate %53 by %c255_i32_46 dim 1 : vector<8x256xf32>, i32 -> vector<8x256xf32>
    %c5_47 = arith.constant 5 : index
    %c0_48 = arith.constant 0 : index
    %76 = vector.load %arg2[%c5_47, %c0_48] : memref<9x256xf32, #tpu.memory_space<vmem>>, vector<1x256xf32>
    %77 = vector.broadcast %76 : vector<1x256xf32> to vector<8x256xf32>
    %78 = arith.mulf %75, %77 : vector<8x256xf32>
    %c184 = arith.constant 184 : index
    %c0_49 = arith.constant 0 : index
    %79 = vector.load %arg14[%c184, %c0_49] : memref<432x256xf32, #tpu.memory_space<vmem>>, vector<8x256xf32>
    tpu.vector_store %arg14[%c184, %c0_49], %78 {strides = array<i32>} : memref<432x256xf32, #tpu.memory_space<vmem>>, vector<8x256xf32>,
    %c241_i32_50 = arith.constant 241 : i32
    %80 = tpu.dynamic_rotate %53 by %c241_i32_50 dim 1 : vector<8x256xf32>, i32 -> vector<8x256xf32>
    %c6_51 = arith.constant 6 : index
    %c0_52 = arith.constant 0 : index
    %81 = vector.load %arg2[%c6_51, %c0_52] : memref<9x256xf32, #tpu.memory_space<vmem>>, vector<1x256xf32>
    %82 = vector.broadcast %81 : vector<1x256xf32> to vector<8x256xf32>
    %83 = arith.mulf %80, %82 : vector<8x256xf32>
    %c192 = arith.constant 192 : index
    %c0_53 = arith.constant 0 : index
    %84 = vector.load %arg14[%c192, %c0_53] : memref<432x256xf32, #tpu.memory_space<vmem>>, vector<8x256xf32>
    tpu.vector_store %arg14[%c192, %c0_53], %83 {strides = array<i32>} : memref<432x256xf32, #tpu.memory_space<vmem>>, vector<8x256xf32>,
    %c240_i32_54 = arith.constant 240 : i32
    %85 = tpu.dynamic_rotate %53 by %c240_i32_54 dim 1 : vector<8x256xf32>, i32 -> vector<8x256xf32>
    %c7_55 = arith.constant 7 : index
    %c0_56 = arith.constant 0 : index
    %86 = vector.load %arg2[%c7_55, %c0_56] : memref<9x256xf32, #tpu.memory_space<vmem>>, vector<1x256xf32>
    %87 = vector.broadcast %86 : vector<1x256xf32> to vector<8x256xf32>
    %88 = arith.mulf %85, %87 : vector<8x256xf32>
    %c200 = arith.constant 200 : index
    %c0_57 = arith.constant 0 : index
    %89 = vector.load %arg14[%c200, %c0_57] : memref<432x256xf32, #tpu.memory_space<vmem>>, vector<8x256xf32>
    tpu.vector_store %arg14[%c200, %c0_57], %88 {strides = array<i32>} : memref<432x256xf32, #tpu.memory_space<vmem>>, vector<8x256xf32>,
    %c239_i32_58 = arith.constant 239 : i32
    %90 = tpu.dynamic_rotate %53 by %c239_i32_58 dim 1 : vector<8x256xf32>, i32 -> vector<8x256xf32>
    %c8_59 = arith.constant 8 : index
    %c0_60 = arith.constant 0 : index
    %91 = vector.load %arg2[%c8_59, %c0_60] : memref<9x256xf32, #tpu.memory_space<vmem>>, vector<1x256xf32>
    %92 = vector.broadcast %91 : vector<1x256xf32> to vector<8x256xf32>
    %93 = arith.mulf %90, %92 : vector<8x256xf32>
    %c208 = arith.constant 208 : index
    %c0_61 = arith.constant 0 : index
    %94 = vector.load %arg14[%c208, %c0_61] : memref<432x256xf32, #tpu.memory_space<vmem>>, vector<8x256xf32>
    tpu.vector_store %arg14[%c208, %c0_61], %93 {strides = array<i32>} : memref<432x256xf32, #tpu.memory_space<vmem>>, vector<8x256xf32>,
    %c0_62 = arith.constant 0 : index
    %c0_63 = arith.constant 0 : index
    %95 = vector.load %arg14[%c0_62, %c0_63] : memref<432x256xf32, #tpu.memory_space<vmem>>, vector<216x256xf32>
    %c0_64 = arith.constant 0 : index
    %c0_65 = arith.constant 0 : index
    %96 = vector.load %arg5[%c0_64, %c0_65] : memref<8x216xf32, #tpu.memory_space<vmem>>, vector<8x216xf32>
    %cst_66 = arith.constant dense<0.000000e+00> : vector<8x256xf32>
    %97 = tpu.matmul %96, %95, %cst_66 {dimension_numbers = #tpu.dot_dimension_numbers<[1], [0], [0], [1], [0, 0, 1, 1], [], []>} : vector<8x216xf32>, vector<216x256xf32>, vector<8x256xf32> -> vector<8x256xf32>
    %c0_67 = arith.constant 0 : index
    %c0_68 = arith.constant 0 : index
    %98 = vector.load %arg6[%c0_67, %c0_68] : memref<8x1xf32, #tpu.memory_space<vmem>>, vector<8x1xf32>
    %99 = vector.broadcast %98 : vector<8x1xf32> to vector<8x256xf32>
    %100 = arith.addf %97, %99 : vector<8x256xf32>
    %cst_69 = arith.constant 0.000000e+00 : f32
    %101 = vector.broadcast %cst_69 : f32 to vector<8x256xf32>
    %102 = arith.cmpf oge, %100, %101 : vector<8x256xf32>
    %cst_70 = arith.constant 2.000000e-01 : f32
    %103 = vector.broadcast %cst_70 : f32 to vector<8x256xf32>
    %104 = arith.mulf %103, %100 : vector<8x256xf32>
    %105 = arith.select %102, %100, %104 : vector<8x256xi1>, vector<8x256xf32>
    %c17_i32_71 = arith.constant 17 : i32
    %106 = tpu.dynamic_rotate %105 by %c17_i32_71 dim 1 : vector<8x256xf32>, i32 -> vector<8x256xf32>
    %c0_72 = arith.constant 0 : index
    %c0_73 = arith.constant 0 : index
    %107 = vector.load %arg2[%c0_72, %c0_73] : memref<9x256xf32, #tpu.memory_space<vmem>>, vector<1x256xf32>
    %108 = vector.broadcast %107 : vector<1x256xf32> to vector<8x256xf32>
    %109 = arith.mulf %106, %108 : vector<8x256xf32>
    %c216 = arith.constant 216 : index
    %c0_74 = arith.constant 0 : index
    %110 = vector.load %arg14[%c216, %c0_74] : memref<432x256xf32, #tpu.memory_space<vmem>>, vector<8x256xf32>
    tpu.vector_store %arg14[%c216, %c0_74], %109 {strides = array<i32>} : memref<432x256xf32, #tpu.memory_space<vmem>>, vector<8x256xf32>,
    %c16_i32_75 = arith.constant 16 : i32
    %111 = tpu.dynamic_rotate %105 by %c16_i32_75 dim 1 : vector<8x256xf32>, i32 -> vector<8x256xf32>
    %c1_76 = arith.constant 1 : index
    %c0_77 = arith.constant 0 : index
    %112 = vector.load %arg2[%c1_76, %c0_77] : memref<9x256xf32, #tpu.memory_space<vmem>>, vector<1x256xf32>
    %113 = vector.broadcast %112 : vector<1x256xf32> to vector<8x256xf32>
    %114 = arith.mulf %111, %113 : vector<8x256xf32>
    %c224 = arith.constant 224 : index
    %c0_78 = arith.constant 0 : index
    %115 = vector.load %arg14[%c224, %c0_78] : memref<432x256xf32, #tpu.memory_space<vmem>>, vector<8x256xf32>
    tpu.vector_store %arg14[%c224, %c0_78], %114 {strides = array<i32>} : memref<432x256xf32, #tpu.memory_space<vmem>>, vector<8x256xf32>,
    %c15_i32_79 = arith.constant 15 : i32
    %116 = tpu.dynamic_rotate %105 by %c15_i32_79 dim 1 : vector<8x256xf32>, i32 -> vector<8x256xf32>
    %c2_80 = arith.constant 2 : index
    %c0_81 = arith.constant 0 : index
    %117 = vector.load %arg2[%c2_80, %c0_81] : memref<9x256xf32, #tpu.memory_space<vmem>>, vector<1x256xf32>
    %118 = vector.broadcast %117 : vector<1x256xf32> to vector<8x256xf32>
    %119 = arith.mulf %116, %118 : vector<8x256xf32>
    %c232 = arith.constant 232 : index
    %c0_82 = arith.constant 0 : index
    %120 = vector.load %arg14[%c232, %c0_82] : memref<432x256xf32, #tpu.memory_space<vmem>>, vector<8x256xf32>
    tpu.vector_store %arg14[%c232, %c0_82], %119 {strides = array<i32>} : memref<432x256xf32, #tpu.memory_space<vmem>>, vector<8x256xf32>,
    %c1_i32_83 = arith.constant 1 : i32
    %121 = tpu.dynamic_rotate %105 by %c1_i32_83 dim 1 : vector<8x256xf32>, i32 -> vector<8x256xf32>
    %c3_84 = arith.constant 3 : index
    %c0_85 = arith.constant 0 : index
    %122 = vector.load %arg2[%c3_84, %c0_85] : memref<9x256xf32, #tpu.memory_space<vmem>>, vector<1x256xf32>
    %123 = vector.broadcast %122 : vector<1x256xf32> to vector<8x256xf32>
    %124 = arith.mulf %121, %123 : vector<8x256xf32>
    %c240 = arith.constant 240 : index
    %c0_86 = arith.constant 0 : index
    %125 = vector.load %arg14[%c240, %c0_86] : memref<432x256xf32, #tpu.memory_space<vmem>>, vector<8x256xf32>
    tpu.vector_store %arg14[%c240, %c0_86], %124 {strides = array<i32>} : memref<432x256xf32, #tpu.memory_space<vmem>>, vector<8x256xf32>,
    %c248 = arith.constant 248 : index
    %c0_87 = arith.constant 0 : index
    %126 = vector.load %arg14[%c248, %c0_87] : memref<432x256xf32, #tpu.memory_space<vmem>>, vector<8x256xf32>
    tpu.vector_store %arg14[%c248, %c0_87], %105 {strides = array<i32>} : memref<432x256xf32, #tpu.memory_space<vmem>>, vector<8x256xf32>,
    %c255_i32_88 = arith.constant 255 : i32
    %127 = tpu.dynamic_rotate %105 by %c255_i32_88 dim 1 : vector<8x256xf32>, i32 -> vector<8x256xf32>
    %c5_89 = arith.constant 5 : index
    %c0_90 = arith.constant 0 : index
    %128 = vector.load %arg2[%c5_89, %c0_90] : memref<9x256xf32, #tpu.memory_space<vmem>>, vector<1x256xf32>
    %129 = vector.broadcast %128 : vector<1x256xf32> to vector<8x256xf32>
    %130 = arith.mulf %127, %129 : vector<8x256xf32>
    %c256 = arith.constant 256 : index
    %c0_91 = arith.constant 0 : index
    %131 = vector.load %arg14[%c256, %c0_91] : memref<432x256xf32, #tpu.memory_space<vmem>>, vector<8x256xf32>
    tpu.vector_store %arg14[%c256, %c0_91], %130 {strides = array<i32>} : memref<432x256xf32, #tpu.memory_space<vmem>>, vector<8x256xf32>,
    %c241_i32_92 = arith.constant 241 : i32
    %132 = tpu.dynamic_rotate %105 by %c241_i32_92 dim 1 : vector<8x256xf32>, i32 -> vector<8x256xf32>
    %c6_93 = arith.constant 6 : index
    %c0_94 = arith.constant 0 : index
    %133 = vector.load %arg2[%c6_93, %c0_94] : memref<9x256xf32, #tpu.memory_space<vmem>>, vector<1x256xf32>
    %134 = vector.broadcast %133 : vector<1x256xf32> to vector<8x256xf32>
    %135 = arith.mulf %132, %134 : vector<8x256xf32>
    %c264 = arith.constant 264 : index
    %c0_95 = arith.constant 0 : index
    %136 = vector.load %arg14[%c264, %c0_95] : memref<432x256xf32, #tpu.memory_space<vmem>>, vector<8x256xf32>
    tpu.vector_store %arg14[%c264, %c0_95], %135 {strides = array<i32>} : memref<432x256xf32, #tpu.memory_space<vmem>>, vector<8x256xf32>,
    %c240_i32_96 = arith.constant 240 : i32
    %137 = tpu.dynamic_rotate %105 by %c240_i32_96 dim 1 : vector<8x256xf32>, i32 -> vector<8x256xf32>
    %c7_97 = arith.constant 7 : index
    %c0_98 = arith.constant 0 : index
    %138 = vector.load %arg2[%c7_97, %c0_98] : memref<9x256xf32, #tpu.memory_space<vmem>>, vector<1x256xf32>
    %139 = vector.broadcast %138 : vector<1x256xf32> to vector<8x256xf32>
    %140 = arith.mulf %137, %139 : vector<8x256xf32>
    %c272 = arith.constant 272 : index
    %c0_99 = arith.constant 0 : index
    %141 = vector.load %arg14[%c272, %c0_99] : memref<432x256xf32, #tpu.memory_space<vmem>>, vector<8x256xf32>
    tpu.vector_store %arg14[%c272, %c0_99], %140 {strides = array<i32>} : memref<432x256xf32, #tpu.memory_space<vmem>>, vector<8x256xf32>,
    %c239_i32_100 = arith.constant 239 : i32
    %142 = tpu.dynamic_rotate %105 by %c239_i32_100 dim 1 : vector<8x256xf32>, i32 -> vector<8x256xf32>
    %c8_101 = arith.constant 8 : index
    %c0_102 = arith.constant 0 : index
    %143 = vector.load %arg2[%c8_101, %c0_102] : memref<9x256xf32, #tpu.memory_space<vmem>>, vector<1x256xf32>
    %144 = vector.broadcast %143 : vector<1x256xf32> to vector<8x256xf32>
    %145 = arith.mulf %142, %144 : vector<8x256xf32>
    %c280 = arith.constant 280 : index
    %c0_103 = arith.constant 0 : index
    %146 = vector.load %arg14[%c280, %c0_103] : memref<432x256xf32, #tpu.memory_space<vmem>>, vector<8x256xf32>
    tpu.vector_store %arg14[%c280, %c0_103], %145 {strides = array<i32>} : memref<432x256xf32, #tpu.memory_space<vmem>>, vector<8x256xf32>,
    %c0_104 = arith.constant 0 : index
    %c0_105 = arith.constant 0 : index
    %147 = vector.load %arg14[%c0_104, %c0_105] : memref<432x256xf32, #tpu.memory_space<vmem>>, vector<288x256xf32>
    %c0_106 = arith.constant 0 : index
    %c0_107 = arith.constant 0 : index
    %148 = vector.load %arg7[%c0_106, %c0_107] : memref<8x288xf32, #tpu.memory_space<vmem>>, vector<8x288xf32>
    %cst_108 = arith.constant dense<0.000000e+00> : vector<8x256xf32>
    %149 = tpu.matmul %148, %147, %cst_108 {dimension_numbers = #tpu.dot_dimension_numbers<[1], [0], [0], [1], [0, 0, 1, 1], [], []>} : vector<8x288xf32>, vector<288x256xf32>, vector<8x256xf32> -> vector<8x256xf32>
    %c0_109 = arith.constant 0 : index
    %c0_110 = arith.constant 0 : index
    %150 = vector.load %arg8[%c0_109, %c0_110] : memref<8x1xf32, #tpu.memory_space<vmem>>, vector<8x1xf32>
    %151 = vector.broadcast %150 : vector<8x1xf32> to vector<8x256xf32>
    %152 = arith.addf %149, %151 : vector<8x256xf32>
    %cst_111 = arith.constant 0.000000e+00 : f32
    %153 = vector.broadcast %cst_111 : f32 to vector<8x256xf32>
    %154 = arith.cmpf oge, %152, %153 : vector<8x256xf32>
    %cst_112 = arith.constant 2.000000e-01 : f32
    %155 = vector.broadcast %cst_112 : f32 to vector<8x256xf32>
    %156 = arith.mulf %155, %152 : vector<8x256xf32>
    %157 = arith.select %154, %152, %156 : vector<8x256xi1>, vector<8x256xf32>
    %c17_i32_113 = arith.constant 17 : i32
    %158 = tpu.dynamic_rotate %157 by %c17_i32_113 dim 1 : vector<8x256xf32>, i32 -> vector<8x256xf32>
    %c0_114 = arith.constant 0 : index
    %c0_115 = arith.constant 0 : index
    %159 = vector.load %arg2[%c0_114, %c0_115] : memref<9x256xf32, #tpu.memory_space<vmem>>, vector<1x256xf32>
    %160 = vector.broadcast %159 : vector<1x256xf32> to vector<8x256xf32>
    %161 = arith.mulf %158, %160 : vector<8x256xf32>
    %c288 = arith.constant 288 : index
    %c0_116 = arith.constant 0 : index
    %162 = vector.load %arg14[%c288, %c0_116] : memref<432x256xf32, #tpu.memory_space<vmem>>, vector<8x256xf32>
    tpu.vector_store %arg14[%c288, %c0_116], %161 {strides = array<i32>} : memref<432x256xf32, #tpu.memory_space<vmem>>, vector<8x256xf32>,
    %c16_i32_117 = arith.constant 16 : i32
    %163 = tpu.dynamic_rotate %157 by %c16_i32_117 dim 1 : vector<8x256xf32>, i32 -> vector<8x256xf32>
    %c1_118 = arith.constant 1 : index
    %c0_119 = arith.constant 0 : index
    %164 = vector.load %arg2[%c1_118, %c0_119] : memref<9x256xf32, #tpu.memory_space<vmem>>, vector<1x256xf32>
    %165 = vector.broadcast %164 : vector<1x256xf32> to vector<8x256xf32>
    %166 = arith.mulf %163, %165 : vector<8x256xf32>
    %c296 = arith.constant 296 : index
    %c0_120 = arith.constant 0 : index
    %167 = vector.load %arg14[%c296, %c0_120] : memref<432x256xf32, #tpu.memory_space<vmem>>, vector<8x256xf32>
    tpu.vector_store %arg14[%c296, %c0_120], %166 {strides = array<i32>} : memref<432x256xf32, #tpu.memory_space<vmem>>, vector<8x256xf32>,
    %c15_i32_121 = arith.constant 15 : i32
    %168 = tpu.dynamic_rotate %157 by %c15_i32_121 dim 1 : vector<8x256xf32>, i32 -> vector<8x256xf32>
    %c2_122 = arith.constant 2 : index
    %c0_123 = arith.constant 0 : index
    %169 = vector.load %arg2[%c2_122, %c0_123] : memref<9x256xf32, #tpu.memory_space<vmem>>, vector<1x256xf32>
    %170 = vector.broadcast %169 : vector<1x256xf32> to vector<8x256xf32>
    %171 = arith.mulf %168, %170 : vector<8x256xf32>
    %c304 = arith.constant 304 : index
    %c0_124 = arith.constant 0 : index
    %172 = vector.load %arg14[%c304, %c0_124] : memref<432x256xf32, #tpu.memory_space<vmem>>, vector<8x256xf32>
    tpu.vector_store %arg14[%c304, %c0_124], %171 {strides = array<i32>} : memref<432x256xf32, #tpu.memory_space<vmem>>, vector<8x256xf32>,
    %c1_i32_125 = arith.constant 1 : i32
    %173 = tpu.dynamic_rotate %157 by %c1_i32_125 dim 1 : vector<8x256xf32>, i32 -> vector<8x256xf32>
    %c3_126 = arith.constant 3 : index
    %c0_127 = arith.constant 0 : index
    %174 = vector.load %arg2[%c3_126, %c0_127] : memref<9x256xf32, #tpu.memory_space<vmem>>, vector<1x256xf32>
    %175 = vector.broadcast %174 : vector<1x256xf32> to vector<8x256xf32>
    %176 = arith.mulf %173, %175 : vector<8x256xf32>
    %c312 = arith.constant 312 : index
    %c0_128 = arith.constant 0 : index
    %177 = vector.load %arg14[%c312, %c0_128] : memref<432x256xf32, #tpu.memory_space<vmem>>, vector<8x256xf32>
    tpu.vector_store %arg14[%c312, %c0_128], %176 {strides = array<i32>} : memref<432x256xf32, #tpu.memory_space<vmem>>, vector<8x256xf32>,
    %c320 = arith.constant 320 : index
    %c0_129 = arith.constant 0 : index
    %178 = vector.load %arg14[%c320, %c0_129] : memref<432x256xf32, #tpu.memory_space<vmem>>, vector<8x256xf32>
    tpu.vector_store %arg14[%c320, %c0_129], %157 {strides = array<i32>} : memref<432x256xf32, #tpu.memory_space<vmem>>, vector<8x256xf32>,
    %c255_i32_130 = arith.constant 255 : i32
    %179 = tpu.dynamic_rotate %157 by %c255_i32_130 dim 1 : vector<8x256xf32>, i32 -> vector<8x256xf32>
    %c5_131 = arith.constant 5 : index
    %c0_132 = arith.constant 0 : index
    %180 = vector.load %arg2[%c5_131, %c0_132] : memref<9x256xf32, #tpu.memory_space<vmem>>, vector<1x256xf32>
    %181 = vector.broadcast %180 : vector<1x256xf32> to vector<8x256xf32>
    %182 = arith.mulf %179, %181 : vector<8x256xf32>
    %c328 = arith.constant 328 : index
    %c0_133 = arith.constant 0 : index
    %183 = vector.load %arg14[%c328, %c0_133] : memref<432x256xf32, #tpu.memory_space<vmem>>, vector<8x256xf32>
    tpu.vector_store %arg14[%c328, %c0_133], %182 {strides = array<i32>} : memref<432x256xf32, #tpu.memory_space<vmem>>, vector<8x256xf32>,
    %c241_i32_134 = arith.constant 241 : i32
    %184 = tpu.dynamic_rotate %157 by %c241_i32_134 dim 1 : vector<8x256xf32>, i32 -> vector<8x256xf32>
    %c6_135 = arith.constant 6 : index
    %c0_136 = arith.constant 0 : index
    %185 = vector.load %arg2[%c6_135, %c0_136] : memref<9x256xf32, #tpu.memory_space<vmem>>, vector<1x256xf32>
    %186 = vector.broadcast %185 : vector<1x256xf32> to vector<8x256xf32>
    %187 = arith.mulf %184, %186 : vector<8x256xf32>
    %c336 = arith.constant 336 : index
    %c0_137 = arith.constant 0 : index
    %188 = vector.load %arg14[%c336, %c0_137] : memref<432x256xf32, #tpu.memory_space<vmem>>, vector<8x256xf32>
    tpu.vector_store %arg14[%c336, %c0_137], %187 {strides = array<i32>} : memref<432x256xf32, #tpu.memory_space<vmem>>, vector<8x256xf32>,
    %c240_i32_138 = arith.constant 240 : i32
    %189 = tpu.dynamic_rotate %157 by %c240_i32_138 dim 1 : vector<8x256xf32>, i32 -> vector<8x256xf32>
    %c7_139 = arith.constant 7 : index
    %c0_140 = arith.constant 0 : index
    %190 = vector.load %arg2[%c7_139, %c0_140] : memref<9x256xf32, #tpu.memory_space<vmem>>, vector<1x256xf32>
    %191 = vector.broadcast %190 : vector<1x256xf32> to vector<8x256xf32>
    %192 = arith.mulf %189, %191 : vector<8x256xf32>
    %c344 = arith.constant 344 : index
    %c0_141 = arith.constant 0 : index
    %193 = vector.load %arg14[%c344, %c0_141] : memref<432x256xf32, #tpu.memory_space<vmem>>, vector<8x256xf32>
    tpu.vector_store %arg14[%c344, %c0_141], %192 {strides = array<i32>} : memref<432x256xf32, #tpu.memory_space<vmem>>, vector<8x256xf32>,
    %c239_i32_142 = arith.constant 239 : i32
    %194 = tpu.dynamic_rotate %157 by %c239_i32_142 dim 1 : vector<8x256xf32>, i32 -> vector<8x256xf32>
    %c8_143 = arith.constant 8 : index
    %c0_144 = arith.constant 0 : index
    %195 = vector.load %arg2[%c8_143, %c0_144] : memref<9x256xf32, #tpu.memory_space<vmem>>, vector<1x256xf32>
    %196 = vector.broadcast %195 : vector<1x256xf32> to vector<8x256xf32>
    %197 = arith.mulf %194, %196 : vector<8x256xf32>
    %c352 = arith.constant 352 : index
    %c0_145 = arith.constant 0 : index
    %198 = vector.load %arg14[%c352, %c0_145] : memref<432x256xf32, #tpu.memory_space<vmem>>, vector<8x256xf32>
    tpu.vector_store %arg14[%c352, %c0_145], %197 {strides = array<i32>} : memref<432x256xf32, #tpu.memory_space<vmem>>, vector<8x256xf32>,
    %c0_146 = arith.constant 0 : index
    %c0_147 = arith.constant 0 : index
    %199 = vector.load %arg14[%c0_146, %c0_147] : memref<432x256xf32, #tpu.memory_space<vmem>>, vector<360x256xf32>
    %c0_148 = arith.constant 0 : index
    %c0_149 = arith.constant 0 : index
    %200 = vector.load %arg9[%c0_148, %c0_149] : memref<8x360xf32, #tpu.memory_space<vmem>>, vector<8x360xf32>
    %cst_150 = arith.constant dense<0.000000e+00> : vector<8x256xf32>
    %201 = tpu.matmul %200, %199, %cst_150 {dimension_numbers = #tpu.dot_dimension_numbers<[1], [0], [0], [1], [0, 0, 1, 1], [], []>} : vector<8x360xf32>, vector<360x256xf32>, vector<8x256xf32> -> vector<8x256xf32>
    %c0_151 = arith.constant 0 : index
    %c0_152 = arith.constant 0 : index
    %202 = vector.load %arg10[%c0_151, %c0_152] : memref<8x1xf32, #tpu.memory_space<vmem>>, vector<8x1xf32>
    %203 = vector.broadcast %202 : vector<8x1xf32> to vector<8x256xf32>
    %204 = arith.addf %201, %203 : vector<8x256xf32>
    %cst_153 = arith.constant 0.000000e+00 : f32
    %205 = vector.broadcast %cst_153 : f32 to vector<8x256xf32>
    %206 = arith.cmpf oge, %204, %205 : vector<8x256xf32>
    %cst_154 = arith.constant 2.000000e-01 : f32
    %207 = vector.broadcast %cst_154 : f32 to vector<8x256xf32>
    %208 = arith.mulf %207, %204 : vector<8x256xf32>
    %209 = arith.select %206, %204, %208 : vector<8x256xi1>, vector<8x256xf32>
    %c17_i32_155 = arith.constant 17 : i32
    %210 = tpu.dynamic_rotate %209 by %c17_i32_155 dim 1 : vector<8x256xf32>, i32 -> vector<8x256xf32>
    %c0_156 = arith.constant 0 : index
    %c0_157 = arith.constant 0 : index
    %211 = vector.load %arg2[%c0_156, %c0_157] : memref<9x256xf32, #tpu.memory_space<vmem>>, vector<1x256xf32>
    %212 = vector.broadcast %211 : vector<1x256xf32> to vector<8x256xf32>
    %213 = arith.mulf %210, %212 : vector<8x256xf32>
    %c360 = arith.constant 360 : index
    %c0_158 = arith.constant 0 : index
    %214 = vector.load %arg14[%c360, %c0_158] : memref<432x256xf32, #tpu.memory_space<vmem>>, vector<8x256xf32>
    tpu.vector_store %arg14[%c360, %c0_158], %213 {strides = array<i32>} : memref<432x256xf32, #tpu.memory_space<vmem>>, vector<8x256xf32>,
    %c16_i32_159 = arith.constant 16 : i32
    %215 = tpu.dynamic_rotate %209 by %c16_i32_159 dim 1 : vector<8x256xf32>, i32 -> vector<8x256xf32>
    %c1_160 = arith.constant 1 : index
    %c0_161 = arith.constant 0 : index
    %216 = vector.load %arg2[%c1_160, %c0_161] : memref<9x256xf32, #tpu.memory_space<vmem>>, vector<1x256xf32>
    %217 = vector.broadcast %216 : vector<1x256xf32> to vector<8x256xf32>
    %218 = arith.mulf %215, %217 : vector<8x256xf32>
    %c368 = arith.constant 368 : index
    %c0_162 = arith.constant 0 : index
    %219 = vector.load %arg14[%c368, %c0_162] : memref<432x256xf32, #tpu.memory_space<vmem>>, vector<8x256xf32>
    tpu.vector_store %arg14[%c368, %c0_162], %218 {strides = array<i32>} : memref<432x256xf32, #tpu.memory_space<vmem>>, vector<8x256xf32>,
    %c15_i32_163 = arith.constant 15 : i32
    %220 = tpu.dynamic_rotate %209 by %c15_i32_163 dim 1 : vector<8x256xf32>, i32 -> vector<8x256xf32>
    %c2_164 = arith.constant 2 : index
    %c0_165 = arith.constant 0 : index
    %221 = vector.load %arg2[%c2_164, %c0_165] : memref<9x256xf32, #tpu.memory_space<vmem>>, vector<1x256xf32>
    %222 = vector.broadcast %221 : vector<1x256xf32> to vector<8x256xf32>
    %223 = arith.mulf %220, %222 : vector<8x256xf32>
    %c376 = arith.constant 376 : index
    %c0_166 = arith.constant 0 : index
    %224 = vector.load %arg14[%c376, %c0_166] : memref<432x256xf32, #tpu.memory_space<vmem>>, vector<8x256xf32>
    tpu.vector_store %arg14[%c376, %c0_166], %223 {strides = array<i32>} : memref<432x256xf32, #tpu.memory_space<vmem>>, vector<8x256xf32>,
    %c1_i32_167 = arith.constant 1 : i32
    %225 = tpu.dynamic_rotate %209 by %c1_i32_167 dim 1 : vector<8x256xf32>, i32 -> vector<8x256xf32>
    %c3_168 = arith.constant 3 : index
    %c0_169 = arith.constant 0 : index
    %226 = vector.load %arg2[%c3_168, %c0_169] : memref<9x256xf32, #tpu.memory_space<vmem>>, vector<1x256xf32>
    %227 = vector.broadcast %226 : vector<1x256xf32> to vector<8x256xf32>
    %228 = arith.mulf %225, %227 : vector<8x256xf32>
    %c384 = arith.constant 384 : index
    %c0_170 = arith.constant 0 : index
    %229 = vector.load %arg14[%c384, %c0_170] : memref<432x256xf32, #tpu.memory_space<vmem>>, vector<8x256xf32>
    tpu.vector_store %arg14[%c384, %c0_170], %228 {strides = array<i32>} : memref<432x256xf32, #tpu.memory_space<vmem>>, vector<8x256xf32>,
    %c392 = arith.constant 392 : index
    %c0_171 = arith.constant 0 : index
    %230 = vector.load %arg14[%c392, %c0_171] : memref<432x256xf32, #tpu.memory_space<vmem>>, vector<8x256xf32>
    tpu.vector_store %arg14[%c392, %c0_171], %209 {strides = array<i32>} : memref<432x256xf32, #tpu.memory_space<vmem>>, vector<8x256xf32>,
    %c255_i32_172 = arith.constant 255 : i32
    %231 = tpu.dynamic_rotate %209 by %c255_i32_172 dim 1 : vector<8x256xf32>, i32 -> vector<8x256xf32>
    %c5_173 = arith.constant 5 : index
    %c0_174 = arith.constant 0 : index
    %232 = vector.load %arg2[%c5_173, %c0_174] : memref<9x256xf32, #tpu.memory_space<vmem>>, vector<1x256xf32>
    %233 = vector.broadcast %232 : vector<1x256xf32> to vector<8x256xf32>
    %234 = arith.mulf %231, %233 : vector<8x256xf32>
    %c400 = arith.constant 400 : index
    %c0_175 = arith.constant 0 : index
    %235 = vector.load %arg14[%c400, %c0_175] : memref<432x256xf32, #tpu.memory_space<vmem>>, vector<8x256xf32>
    tpu.vector_store %arg14[%c400, %c0_175], %234 {strides = array<i32>} : memref<432x256xf32, #tpu.memory_space<vmem>>, vector<8x256xf32>,
    %c241_i32_176 = arith.constant 241 : i32
    %236 = tpu.dynamic_rotate %209 by %c241_i32_176 dim 1 : vector<8x256xf32>, i32 -> vector<8x256xf32>
    %c6_177 = arith.constant 6 : index
    %c0_178 = arith.constant 0 : index
    %237 = vector.load %arg2[%c6_177, %c0_178] : memref<9x256xf32, #tpu.memory_space<vmem>>, vector<1x256xf32>
    %238 = vector.broadcast %237 : vector<1x256xf32> to vector<8x256xf32>
    %239 = arith.mulf %236, %238 : vector<8x256xf32>
    %c408 = arith.constant 408 : index
    %c0_179 = arith.constant 0 : index
    %240 = vector.load %arg14[%c408, %c0_179] : memref<432x256xf32, #tpu.memory_space<vmem>>, vector<8x256xf32>
    tpu.vector_store %arg14[%c408, %c0_179], %239 {strides = array<i32>} : memref<432x256xf32, #tpu.memory_space<vmem>>, vector<8x256xf32>,
    %c240_i32_180 = arith.constant 240 : i32
    %241 = tpu.dynamic_rotate %209 by %c240_i32_180 dim 1 : vector<8x256xf32>, i32 -> vector<8x256xf32>
    %c7_181 = arith.constant 7 : index
    %c0_182 = arith.constant 0 : index
    %242 = vector.load %arg2[%c7_181, %c0_182] : memref<9x256xf32, #tpu.memory_space<vmem>>, vector<1x256xf32>
    %243 = vector.broadcast %242 : vector<1x256xf32> to vector<8x256xf32>
    %244 = arith.mulf %241, %243 : vector<8x256xf32>
    %c416 = arith.constant 416 : index
    %c0_183 = arith.constant 0 : index
    %245 = vector.load %arg14[%c416, %c0_183] : memref<432x256xf32, #tpu.memory_space<vmem>>, vector<8x256xf32>
    tpu.vector_store %arg14[%c416, %c0_183], %244 {strides = array<i32>} : memref<432x256xf32, #tpu.memory_space<vmem>>, vector<8x256xf32>,
    %c239_i32_184 = arith.constant 239 : i32
    %246 = tpu.dynamic_rotate %209 by %c239_i32_184 dim 1 : vector<8x256xf32>, i32 -> vector<8x256xf32>
    %c8_185 = arith.constant 8 : index
    %c0_186 = arith.constant 0 : index
    %247 = vector.load %arg2[%c8_185, %c0_186] : memref<9x256xf32, #tpu.memory_space<vmem>>, vector<1x256xf32>
    %248 = vector.broadcast %247 : vector<1x256xf32> to vector<8x256xf32>
    %249 = arith.mulf %246, %248 : vector<8x256xf32>
    %c424 = arith.constant 424 : index
    %c0_187 = arith.constant 0 : index
    %250 = vector.load %arg14[%c424, %c0_187] : memref<432x256xf32, #tpu.memory_space<vmem>>, vector<8x256xf32>
    tpu.vector_store %arg14[%c424, %c0_187], %249 {strides = array<i32>} : memref<432x256xf32, #tpu.memory_space<vmem>>, vector<8x256xf32>,
    %c0_188 = arith.constant 0 : index
    %c0_189 = arith.constant 0 : index
    %251 = vector.load %arg14[%c0_188, %c0_189] : memref<432x256xf32, #tpu.memory_space<vmem>>, vector<432x256xf32>
    %c0_190 = arith.constant 0 : index
    %c0_191 = arith.constant 0 : index
    %252 = vector.load %arg11[%c0_190, %c0_191] : memref<16x432xf32, #tpu.memory_space<vmem>>, vector<16x432xf32>
    %cst_192 = arith.constant dense<0.000000e+00> : vector<16x256xf32>
    %253 = tpu.matmul %252, %251, %cst_192 {dimension_numbers = #tpu.dot_dimension_numbers<[1], [0], [0], [1], [0, 0, 1, 1], [], []>} : vector<16x432xf32>, vector<432x256xf32>, vector<16x256xf32> -> vector<16x256xf32>
    %c0_193 = arith.constant 0 : index
    %c0_194 = arith.constant 0 : index
    %254 = vector.load %arg12[%c0_193, %c0_194] : memref<16x1xf32, #tpu.memory_space<vmem>>, vector<16x1xf32>
    %255 = vector.broadcast %254 : vector<16x1xf32> to vector<16x256xf32>
    %256 = arith.addf %253, %255 : vector<16x256xf32>
    %cst_195 = arith.constant 2.000000e-01 : f32
    %257 = vector.broadcast %cst_195 : f32 to vector<16x256xf32>
    %258 = arith.mulf %256, %257 : vector<16x256xf32>
    %259 = arith.addf %258, %1 : vector<16x256xf32>
    %c0_196 = arith.constant 0 : index
    %c0_197 = arith.constant 0 : index
    %c0_198 = arith.constant 0 : index
    %260 = vector.load %arg13[%c0_196, %c0_197, %c0_198] : memref<1x16x256xf32, #tpu.memory_space<vmem>>, vector<1x16x256xf32>
    %261 = vector.shape_cast %260 : vector<1x16x256xf32> to vector<16x256xf32>
    %262 = vector.shape_cast %259 : vector<16x256xf32> to vector<1x16x256xf32>
    tpu.vector_store %arg13[%c0_196, %c0_197, %c0_198], %262 {strides = array<i32>} : memref<1x16x256xf32, #tpu.memory_space<vmem>>, vector<1x16x256xf32>,
    return
  }
  func.func @transform_0(%arg0: i32) -> (i32, i32, i32) {
    %c0_i32 = arith.constant 0 : i32
    %c0_i32_0 = arith.constant 0 : i32
    %c0_i32_1 = arith.constant 0 : i32
    return %arg0, %c0_i32, %c0_i32_0 : i32, i32, i32
  }
  func.func @transform_1(%arg0: i32) -> (i32, i32) {
    %c0_i32 = arith.constant 0 : i32
    %c0_i32_0 = arith.constant 0 : i32
    %c0_i32_1 = arith.constant 0 : i32
    return %c0_i32, %c0_i32_0 : i32, i32
  }
  func.func @transform_2(%arg0: i32) -> (i32, i32) {
    %c0_i32 = arith.constant 0 : i32
    %c0_i32_0 = arith.constant 0 : i32
    %c0_i32_1 = arith.constant 0 : i32
    return %c0_i32, %c0_i32_0 : i32, i32
  }
  func.func @transform_3(%arg0: i32) -> (i32, i32) {
    %c0_i32 = arith.constant 0 : i32
    %c0_i32_0 = arith.constant 0 : i32
    %c0_i32_1 = arith.constant 0 : i32
    return %c0_i32, %c0_i32_0 : i32, i32
  }
  func.func @transform_4(%arg0: i32) -> (i32, i32) {
    %c0_i32 = arith.constant 0 : i32
    %c0_i32_0 = arith.constant 0 : i32
    %c0_i32_1 = arith.constant 0 : i32
    return %c0_i32, %c0_i32_0 : i32, i32
  }
  func.func @transform_5(%arg0: i32) -> (i32, i32) {
    %c0_i32 = arith.constant 0 : i32
    %c0_i32_0 = arith.constant 0 : i32
    %c0_i32_1 = arith.constant 0 : i32
    return %c0_i32, %c0_i32_0 : i32, i32
  }
  func.func @transform_6(%arg0: i32) -> (i32, i32) {
    %c0_i32 = arith.constant 0 : i32
    %c0_i32_0 = arith.constant 0 : i32
    %c0_i32_1 = arith.constant 0 : i32
    return %c0_i32, %c0_i32_0 : i32, i32
  }
  func.func @transform_7(%arg0: i32) -> (i32, i32) {
    %c0_i32 = arith.constant 0 : i32
    %c0_i32_0 = arith.constant 0 : i32
    %c0_i32_1 = arith.constant 0 : i32
    return %c0_i32, %c0_i32_0 : i32, i32
  }
  func.func @transform_8(%arg0: i32) -> (i32, i32) {
    %c0_i32 = arith.constant 0 : i32
    %c0_i32_0 = arith.constant 0 : i32
    %c0_i32_1 = arith.constant 0 : i32
    return %c0_i32, %c0_i32_0 : i32, i32
  }
  func.func @transform_9(%arg0: i32) -> (i32, i32) {
    %c0_i32 = arith.constant 0 : i32
    %c0_i32_0 = arith.constant 0 : i32
    %c0_i32_1 = arith.constant 0 : i32
    return %c0_i32, %c0_i32_0 : i32, i32
  }
  func.func @transform_10(%arg0: i32) -> (i32, i32) {
    %c0_i32 = arith.constant 0 : i32
    %c0_i32_0 = arith.constant 0 : i32
    %c0_i32_1 = arith.constant 0 : i32
    return %c0_i32, %c0_i32_0 : i32, i32
  }
  func.func @transform_11(%arg0: i32) -> (i32, i32) {
    %c0_i32 = arith.constant 0 : i32
    %c0_i32_0 = arith.constant 0 : i32
    %c0_i32_1 = arith.constant 0 : i32
    return %c0_i32, %c0_i32_0 : i32, i32
  }
  func.func @transform_12(%arg0: i32) -> (i32, i32, i32) {
    %c0_i32 = arith.constant 0 : i32
    %c0_i32_0 = arith.constant 0 : i32
    %c0_i32_1 = arith.constant 0 : i32
    return %arg0, %c0_i32, %c0_i32_0 : i32, i32, i32
  }
}

</mosaic_0001>

<bundles_post_ra>
// kernel: residual_dense_block_5c.1
= control target key start
LH: loop header
LB: loop body
LE: loop exit
PB: predicated region body
PF: predicated region fallthrough
CT: control target
= control target key end

     0   :  { %s2445_s21 = smov 0   ;;  %s3753_s0 = inlined_call_operand.vmem [shape: f32[2,16,256], index: 0, kind: input, shape index: {}]   ;;  %s3754_s1 = inlined_call_operand.vmem [shape: f32[9,256], index: 1, kind: input, shape index: {}]   ;;  %s3755_s2 = inlined_call_operand.vmem [shape: f32[8,144], index: 2, kind: input, shape index: {}]   ;;  %s3756_s3 = inlined_call_operand.vmem [shape: f32[8,1], index: 3, kind: input, shape index: {}, may-alias: {3,5,7,9}]   ;;  %s3757_s4 = inlined_call_operand.vmem [shape: f32[8,216], index: 4, kind: input, shape index: {}]   ;;  %s3758_s5 = inlined_call_operand.vmem [shape: f32[8,1], index: 5, kind: input, shape index: {}, may-alias: {3,5,7,9}]   ;;  %s3759_s6 = inlined_call_operand.vmem [shape: f32[8,288], index: 6, kind: input, shape index: {}]   ;;  %s3760_s7 = inlined_call_operand.vmem [shape: f32[8,1], index: 7, kind: input, shape index: {}, may-alias: {3,5,7,9}]   ;;  %s3761_s8 = inlined_call_operand.vmem [shape: f32[8,360], index: 8, kind: input, shape index: {}]   ;;  %s3762_s9 = inlined_call_operand.vmem [shape: f32[8,1], index: 9, kind: input, shape index: {}, may-alias: {3,5,7,9}]   ;;  %s3763_s10 = inlined_call_operand.vmem [shape: f32[16,432], index: 10, kind: input, shape index: {}]   ;;  %s3764_s11 = inlined_call_operand.vmem [shape: f32[16,1], index: 11, kind: input, shape index: {}]   ;;  %s3765_s12 = inlined_call_operand.vmem [shape: f32[2,16,256], index: 12, kind: output, shape index: {}]  }
   0x1 LB: > { %s2279_s22 = sadd.s32 4294967295, %s2369_s21   ;;  %p2283_p0 = scmp.ge.s32.totalorder %s2369_s21, 1  ;;  %s2369_s21 = sphi %s2445_s21, %s22_s21  }
   0x2   : > { %p362_p1 = scmp.lt.s32.totalorder %s2369_s21, 3 }
   0x4   : > { %p363_p2 = pnand %p2283_p0, %p362_p1 }
   0x6   : > { %366 = sbr.rel (%p363_p2) target bundleno = 1609 (0x649), region = 68 }
   0xb   : > { %p404_p3 = scmp.lt.s32.totalorder %s2279_s22, 1  ;;  %s2371_s27 = smov 112   ;;  %v426_v9 = vlaneseq  ;;  %v2552_v10 = vld [vmem:[%s3754_s1 + $0x7] ss:$8 sm:$0x3]  ;;  %vm691_vm6 = vcmask 130048  }
   0xc   : > { %s2372_s28 = smov 113   ;;  %s2373_s29 = smov 127   ;;  %v607_v12 = vperm.slane %v2552_v10, 0  ;;  %v2561_v13 = vld [vmem:[%s3754_s1 + $0x6] ss:$8 sm:$0x3] }
   0xd   : > { %s3903_s22 = smov (!%p404_p3, %s2279_s22), 1  ;;  %s2374_s30 = smov 1   ;;  %v2554_v11 = vand.u32 127, %v426_v9  ;;  %v579_v19 = vperm.slane %v2561_v13, 0  ;;  %v608_v63 = vperm.slane %v2552_v10, 1  ;;  %vm973_vm11 = vcmask 719872  }
   0xe   : > { %s3770_s23 = sshll.u32 %s3903_s22, 5  ;;  %s2375_s13 = smov 15   ;;  %v2608_v28 = vld [vmem:[%s3754_s1 + $0x5] ss:$8 sm:$0x3]  ;;  %vm1274_vm14 = vcmask 261120  }
   0xf   : > { %s2461_s26 = scalar_lea.vmem %s3753_s0, %s3770_s23  ;;  %s2376_s14 = smov 111   ;;  %vm599_vm0 = vcmp.lt.s32.totalorder %v2554_v11, 112  ;;  %vm571_vm1 = vcmp.lt.s32.totalorder %v2554_v11, 113  ;;  %vm543_vm2 = vcmp.lt.s32.totalorder %v2554_v11, 127  ;;  %v551_v30 = vperm.slane %v2608_v28, 0 }
  0x10   : > { %v2464_v0 = vld [vmem:[%s2461_s26 + $0x10] sm:$0xff]  ;;  %v2467_v1 = vld [vmem:[%s2461_s26] sm:$0xff]  ;;  %v2476_v2 = vld [vmem:[%s2461_s26 + $0x18] sm:$0xff]  ;;  %s2377_s15 = smov 16   ;;  %s3771_s16 = smov 17   ;;  %vm511_vm3 = vcmp.lt.s32.totalorder %v2554_v11, 1 }
  0x11   : > { %593 = vrot.lane.b32.xlu0 %v2464_v0, %s2371_s27  ;;  %591 = vrot.lane.b32.xlu1 %v2467_v1, %s2371_s27  ;;  %v2479_v3 = vld [vmem:[%s2461_s26 + $0x8] sm:$0xff]  ;;  %vm483_vm4 = vcmp.lt.s32.totalorder %v2554_v11, 15  ;;  %v2294_v52 = vld [vmem:[%s3754_s1 + $0x10] ss:$8 sm:$0x3]  ;;  %vm627_vm5 = vcmp.lt.s32.totalorder %v2554_v11, 111 }
  0x12   : > { %565 = vrot.lane.b32.xlu2 %v2464_v0, %s2372_s28  ;;  %v2633_v36 = vld [vmem:[%s3754_s1 + $0x3] ss:$8 sm:$0x3]  ;;  %v2664_v44 = vld [vmem:[%s3754_s1 + $0x2] ss:$8 sm:$0x3] }
  0x13   : > { %v519_v39 = vperm.slane %v2633_v36, 0  ;;  %v491_v47 = vperm.slane %v2664_v44, 0  ;;  %v635_v54 = vperm.slane %v2294_v52, 0  ;;  %v636_v55 = vperm.slane %v2294_v52, 1  ;;  %s3874_s25 = smov 17   ;;  %s3901_s20 = sshll.u32 %s3903_s22, 5 }
  0x14   : > { %vm455_vm7 = vcmp.lt.s32.totalorder %v2554_v11, 16  ;;  %vm428_vm8 = vcmp.lt.s32.totalorder %v2554_v11, 17  ;;  %s3740_s18 = scalar_lea.vmem %s3765_s12, %s3901_s20 }
  0x19   : > { %597 = vrot.lane.b32.xlu0 %v2476_v2, %s2371_s27  ;;  %595 = vrot.lane.b32.xlu1 %v2479_v3, %s2371_s27 }
  0x1a   : > { %569 = vrot.lane.b32.xlu2 %v2476_v2, %s2372_s28 }
  0x21   : > { %563 = vrot.lane.b32.xlu0 %v2467_v1, %s2372_s28  ;;  %567 = vrot.lane.b32.xlu1 %v2479_v3, %s2372_s28 }
  0x22   : > { %537 = vrot.lane.b32.xlu2 %v2464_v0, %s2373_s29 }
  0x29   : > { %541 = vrot.lane.b32.xlu0 %v2476_v2, %s2373_s29  ;;  %535 = vrot.lane.b32.xlu1 %v2467_v1, %s2373_s29 }
  0x2a   : > { %539 = vrot.lane.b32.xlu2 %v2479_v3, %s2373_s29 }
  0x31   : > { %505 = vrot.lane.b32.xlu0 %v2464_v0, %s2374_s30  ;;  %509 = vrot.lane.b32.xlu1 %v2476_v2, %s2374_s30 }
  0x32   : > { %503 = vrot.lane.b32.xlu2 %v2467_v1, %s2374_s30 }
  0x39   : > { %507 = vrot.lane.b32.xlu0 %v2479_v3, %s2374_s30  ;;  %477 = vrot.lane.b32.xlu1 %v2464_v0, %s2375_s13 }
  0x3a   : > { %481 = vrot.lane.b32.xlu2 %v2476_v2, %s2375_s13 }
  0x41   : > { %621 = vrot.lane.b32.xlu0 %v2464_v0, %s2376_s14  ;;  %625 = vrot.lane.b32.xlu1 %v2476_v2, %s2376_s14 }
  0x42   : > { %475 = vrot.lane.b32.xlu2 %v2467_v1, %s2375_s13 }
  0x49   : > { %479 = vrot.lane.b32.xlu0 %v2479_v3, %s2375_s13  ;;  %619 = vrot.lane.b32.xlu1 %v2467_v1, %s2376_s14 }
  0x4a   : > { %623 = vrot.lane.b32.xlu2 %v2479_v3, %s2376_s14 }
  0x51   : > { %449 = vrot.lane.b32.xlu0 %v2464_v0, %s2377_s15  ;;  %453 = vrot.lane.b32.xlu1 %v2476_v2, %s2377_s15 }
  0x52   : > { %447 = vrot.lane.b32.xlu2 %v2467_v1, %s2377_s15 }
  0x59   : > { %451 = vrot.lane.b32.xlu0 %v2479_v3, %s2377_s15  ;;  %420 = vrot.lane.b32.xlu1 %v2464_v0, %s3771_s16 }
  0x5a   : > { %424 = vrot.lane.b32.xlu2 %v2476_v2, %s3771_s16 }
  0x61   : > { %418 = vrot.lane.b32.xlu0 %v2467_v1, %s3771_s16  ;;  %422 = vrot.lane.b32.xlu1 %v2479_v3, %s3771_s16 }
  0x6c   : > { %v2539_v4 = vpop.permute.xlu2 %565 }
  0x74   : > { %v2541_v5 = vpop.permute.xlu2 %569 }
  0x75   : > { %v573_v21 = vsel %vm571_vm1, %v2539_v4, %v2541_v5 }
  0x76   : > { %v2589_v23 = vmul.f32 %v579_v19, %v573_v21 }
  0x7c   : > { %v2543_v6 = vpop.permute.xlu2 %537 }
  0x83   : > { %v2545_v7 = vpop.permute.xlu0 %593  ;;  %v2547_v8 = vpop.permute.xlu1 %591 }
  0x84   : > { %v2576_v18 = vpop.permute.xlu2 %539 }
  0x8b   : > { %v2564_v14 = vpop.permute.xlu0 %597  ;;  %v2566_v15 = vpop.permute.xlu1 %595 }
  0x8c   : > { %v601_v16 = vsel %vm599_vm0, %v2545_v7, %v2564_v14  ;;  %v600_v17 = vsel %vm599_vm0, %v2547_v8, %v2566_v15  ;;  %v2610_v29 = vpop.permute.xlu2 %503 }
  0x8d   : > { %v2579_v20 = vmul.f32 %v607_v12, %v601_v16  ;;  %v2585_v22 = vmul.f32 %v607_v12, %v600_v17  ;;  %v603_v16 = vsel %vm599_vm0, %v2564_v14, %v2545_v7  ;;  %v602_v7 = vsel %vm599_vm0, %v2566_v15, %v2547_v8  ;;  %v2732_v14 = vld [vmem:[%s3754_s1 + $0x1] ss:$8 sm:$0x3] }
  0x8e   : > { %v575_v8 = vsel %vm571_vm1, %v2541_v5, %v2539_v4  ;;  %v463_v15 = vperm.slane %v2732_v14, 0  ;;  %v552_v5 = vperm.slane %v2608_v28, 1 }
  0x8f   : > { %695 = vmatpush.msra.mxu0 %v2579_v20  ;;  %977 = vmatpush.msra.mxu1 %v2579_v20 }
  0x91   : > { %696 = vmatpush.msra.mxu0 %v2585_v22  ;;  %978 = vmatpush.msra.mxu1 %v2585_v22 }
  0x93   : > { %v2593_v24 = vpop.permute.xlu0 %563  ;;  %697 = vmatpush.msra.mxu0 %v2589_v23  ;;  %979 = vmatpush.msra.mxu1 %v2589_v23  ;;  %v2597_v25 = vpop.permute.xlu1 %567 }
  0x94   : > { %v572_v26 = vsel %vm571_vm1, %v2593_v24, %v2597_v25  ;;  %v2639_v38 = vpop.permute.xlu2 %481 }
  0x95   : > { %v2603_v27 = vmul.f32 %v579_v19, %v572_v26 }
  0x97   : > { %698 = vmatpush.msra.mxu0 %v2603_v27  ;;  %980 = vmatpush.msra.mxu1 %v2603_v27 }
  0x9b   : > { %v2616_v31 = vpop.permute.xlu0 %541  ;;  %v2618_v32 = vpop.permute.xlu1 %535 }
  0x9c   : > { %v545_v33 = vsel %vm543_vm2, %v2543_v6, %v2616_v31  ;;  %v544_v34 = vsel %vm543_vm2, %v2618_v32, %v2576_v18  ;;  %v2667_v45 = vpop.permute.xlu2 %475  ;;  %v547_v52 = vsel %vm543_vm2, %v2616_v31, %v2543_v6  ;;  %v433_v6 = vld [vmem:[%s3754_s1] ss:$8 sm:$0x3] }
  0x9d   : > { %v2628_v35 = vmul.f32 %v551_v30, %v545_v33  ;;  %v2635_v37 = vmul.f32 %v551_v30, %v544_v34  ;;  %v580_v33 = vperm.slane %v2561_v13, 1  ;;  %v2735_v34 = vmul.f32 %v608_v63, %v603_v16 }
  0x9e   : > { %v2750_v13 = vmul.f32 %v608_v63, %v602_v7  ;;  %v2778_v28 = vmul.f32 %v552_v5, %v547_v52 }
  0x9f   : > { %699 = vmatpush.msra.mxu0 %v2628_v35  ;;  %981 = vmatpush.msra.mxu1 %v2628_v35  ;;  %3829 = vst [vmem:[#allocation6_spill] sm:$0xff] %v2735_v34  ;;  %v2759_v4 = vmul.f32 %v580_v33, %v575_v8  ;;  %v436_v8 = vperm.slane %v433_v6, 1 }
  0xa0   : > { %3830 = vst [vmem:[#allocation7_spill] sm:$0xff] %v2750_v13 }
  0xa1   : > { %700 = vmatpush.msra.mxu0 %v2635_v37  ;;  %982 = vmatpush.msra.mxu1 %v2635_v37  ;;  %3831 = vst [vmem:[#allocation8_spill] sm:$0xff] %v2759_v4 }
  0xa2   : > { %3834 = vst [vmem:[#allocation11_spill] sm:$0xff] %v2778_v28 }
  0xa3   : > { %v2645_v40 = vpop.permute.xlu0 %505  ;;  %701 = vmatpush.msra.mxu0 %v2464_v0  ;;  %983 = vmatpush.msra.mxu1 %v2464_v0  ;;  %v2649_v41 = vpop.permute.xlu1 %509 }
  0xa4   : > { %v515_v42 = vsel %vm511_vm3, %v2649_v41, %v2645_v40  ;;  %v624_v62 = vpop.permute.xlu2 %623 }
  0xa5   : > { %v2655_v43 = vmul.f32 %v519_v39, %v515_v42  ;;  %702 = vmatpush.msra.mxu0 %v2467_v1  ;;  %984 = vmatpush.msra.mxu1 %v2467_v1  ;;  %v684_v42 = vld [vmem:[%s3755_s2 + $0x8] sm:$0xff] }
  0xa7   : > { %703 = vmatpush.msra.mxu0 %v2655_v43  ;;  %985 = vmatpush.msra.mxu1 %v2655_v43 }
  0xab   : > { %v2669_v46 = vpop.permute.xlu0 %507  ;;  %v2672_v48 = vpop.permute.xlu1 %477 }
  0xac   : > { %v514_v49 = vsel %vm511_vm3, %v2669_v46, %v2610_v29  ;;  %v487_v50 = vsel %vm483_vm4, %v2639_v38, %v2672_v48 }
  0xad   : > { %v2682_v51 = vmul.f32 %v519_v39, %v514_v49  ;;  %v2687_v53 = vmul.f32 %v491_v47, %v487_v50  ;;  %v2739_v39 = vpop.permute.xlu2 %447 }
  0xaf   : > { %3826 = vst [vmem:[#allocation3_spill] sm:$0xff] %v2682_v51  ;;  %704 = vmatpush.msra.mxu0 %v2682_v51  ;;  %986 = vmatpush.msra.mxu1 %v2682_v51 }
  0xb0   : > { %3827 = vst [vmem:[#allocation4_spill] sm:$0xff] %v2687_v53 }
  0xb1   : > { %705 = vmatpush.msra.mxu0 %v2687_v53  ;;  %987 = vmatpush.msra.mxu1 %v2687_v53 }
  0xb3   : > { %v622_v56 = vpop.permute.xlu0 %621  ;;  %v626_v57 = vpop.permute.xlu1 %625 }
  0xb4   : > { %v629_v58 = vsel %vm627_vm5, %v622_v56, %v626_v57  ;;  %v631_v59 = vsel %vm627_vm5, %v626_v57, %v622_v56  ;;  %v435_v57 = vperm.slane %v433_v6, 0 }
  0xb5   : > { %v2698_v60 = vmul.f32 %v635_v54, %v629_v58  ;;  %v2700_v61 = vmul.f32 %v636_v55, %v631_v59  ;;  %v425_v56 = vpop.permute.xlu2 %424  ;;  %v513_v59 = vsel %vm511_vm3, %v2645_v40, %v2649_v41  ;;  %v492_v40 = vperm.slane %v2664_v44, 1 }
  0xb7   : > { %729 = vmatpush.msra.mxu2 %v2698_v60  ;;  %769 = vmatpush.msra.mxu3 %v2700_v61 }
  0xbb   : > { %v2705_v9 = vpop.permute.xlu0 %479  ;;  %v620_v12 = vpop.permute.xlu1 %619 }
  0xbc   : > { %v486_v17 = vsel %vm483_vm4, %v2705_v9, %v2667_v45  ;;  %v628_v19 = vsel %vm627_vm5, %v620_v12, %v624_v62  ;;  %v630_v21 = vsel %vm627_vm5, %v624_v62, %v620_v12 }
  0xbd   : > { %v2719_v10 = vmul.f32 %v491_v47, %v486_v17  ;;  %v2721_v26 = vmul.f32 %v635_v54, %v628_v19  ;;  %v2723_v30 = vmul.f32 %v636_v55, %v630_v21  ;;  %v574_v47 = vsel %vm571_vm1, %v2597_v25, %v2593_v24 }
  0xbe   : > { %v2769_v55 = vmul.f32 %v580_v33, %v574_v47  ;;  %v546_v25 = vsel %vm543_vm2, %v2576_v18, %v2618_v32  ;;  %v520_v18 = vperm.slane %v2633_v36, 1  ;;  %v512_v36 = vsel %vm511_vm3, %v2610_v29, %v2669_v46 }
  0xbf   : > { %3828 = vst [vmem:[#allocation5_spill] sm:$0xff] %v2719_v10  ;;  %706 = vmatpush.msra.mxu0 %v2719_v10  ;;  %730 = vmatpush.msra.mxu2 %v2721_v26  ;;  %v2786_v31 = vmul.f32 %v552_v5, %v546_v25  ;;  %v485_v17 = vsel %vm483_vm4, %v2672_v48, %v2639_v38  ;;  %v464_v46 = vperm.slane %v2732_v14, 1 }
  0xc0   : > { %770 = vmatpush.msra.mxu3 %v2723_v30  ;;  %988 = vmatpush.msra.mxu1 %v2719_v10  ;;  %3832 = vst [vmem:[#allocation9_spill] sm:$0xff] %v2769_v55  ;;  %v2808_v16 = vmul.f32 %v520_v18, %v513_v59  ;;  %v2820_v19 = vmul.f32 %v520_v18, %v512_v36 }
  0xc1   : > { %735 = vmatpush.msrb.mxu2 %v2735_v34  ;;  %2296 = vmatmul.msk.f32.vlgmr.msra.gmra.mxu3 %vm691_vm6, %v684_v42  ;;  %3835 = vst [vmem:[#allocation12_spill] sm:$0xff] %v2786_v31  ;;  %v484_v29 = vsel %vm483_vm4, %v2667_v45, %v2705_v9  ;;  %v2829_v44 = vmul.f32 %v492_v40, %v485_v17  ;;  %v683_v45 = vld [vmem:[%s3755_s2] sm:$0xff] }
  0xc2   : > { %2295 = vmatmul.msk.f32.vlgmr.msra.gmra.mxu2 %vm691_vm6, %v684_v42  ;;  %3837 = vst [vmem:[#allocation14_spill] sm:$0xff] %v2808_v16  ;;  %v2837_v33 = vmul.f32 %v492_v40, %v484_v29 }
  0xc3   : > { %736 = vmatpush.msrb.mxu2 %v2750_v13  ;;  %v450_v49 = vpop.permute.xlu0 %449  ;;  %v454_v50 = vpop.permute.xlu1 %453  ;;  %3839 = vst [vmem:[#allocation16_spill] sm:$0xff] %v2820_v19 }
  0xc4   : > { %v459_v54 = vsel %vm455_vm7, %v454_v50, %v450_v49  ;;  %3840 = vst [vmem:[#allocation17_spill] sm:$0xff] %v2829_v44  ;;  %v457_v21 = vsel %vm455_vm7, %v450_v49, %v454_v50  ;;  %v685_v49 = vld [vmem:[%s3756_s3] sm:$0xff]  ;;  %v2379_v50 = vmov 0  }
  0xc5   : > { %v2771_v24 = vmul.f32 %v463_v15, %v459_v54  ;;  %737 = vmatpush.msrb.mxu2 %v2759_v4  ;;  %3841 = vst [vmem:[#allocation18_spill] sm:$0xff] %v2837_v33  ;;  %v2848_v14 = vmul.f32 %v464_v46, %v457_v21  ;;  %2356 = vset.pattern.permute.xlu2 %v2379_v50 }
  0xc6   : > { %2357 = vset.pattern.permute.xlu1 %v2379_v50  ;;  %688 = vperm.xlu2 %2356, %v685_v49  }
  0xc7   : > { %3833 = vst [vmem:[#allocation10_spill] sm:$0xff] %v2771_v24  ;;  %738 = vmatpush.msrb.mxu2 %v2769_v55  ;;  %707 = vmatpush.msra.mxu0 %v2771_v24 }
  0xc8   : > { %989 = vmatpush.msra.mxu1 %v2771_v24  ;;  %3843 = vst [vmem:[#allocation20_spill] sm:$0xff] %v2848_v14  ;;  %2358 = vset.pattern.permute.xlu0 %v2379_v50  ;;  %v2302_v50 = vld [vmem:[%s3754_s1 + $0x7] ss:$8 sm:$0x3] }
  0xc9   : > { %739 = vmatpush.msrb.mxu2 %v2778_v28  ;;  %v3890_v11 = vld [vmem:[#allocation12_spill] sm:$0xff] }
  0xcb   : > { %740 = vmatpush.msrb.mxu2 %v2786_v31  ;;  %v452_v32 = vpop.permute.xlu0 %451  ;;  %v421_v58 = vpop.permute.xlu1 %420 }
  0xcc   : > { %v458_v62 = vsel %vm455_vm7, %v452_v32, %v2739_v39  ;;  %v432_v63 = vsel %vm428_vm8, %v425_v56, %v421_v58  ;;  %v456_v9 = vsel %vm455_vm7, %v2739_v39, %v452_v32 }
  0xcd   : > { %v2801_v12 = vmul.f32 %v463_v15, %v458_v62  ;;  %741 = vmatpush.msrb.mxu2 %v2476_v2  ;;  %v2811_v41 = vmul.f32 %v435_v57, %v432_v63  ;;  %v430_v15 = vsel %vm428_vm8, %v421_v58, %v425_v56  ;;  %v2855_v47 = vmul.f32 %v464_v46, %v456_v9 }
  0xce   : > { %v2860_v5 = vmul.f32 %v436_v8, %v430_v15 }
  0xcf   : > { %3836 = vst [vmem:[#allocation13_spill] sm:$0xff] %v2801_v12  ;;  %742 = vmatpush.msrb.mxu2 %v2479_v3  ;;  %708 = vmatpush.msra.mxu0 %v2801_v12 }
  0xd0   : > { %3838 = vst [vmem:[#allocation15_spill] sm:$0xff] %v2811_v41  ;;  %990 = vmatpush.msra.mxu1 %v2801_v12 }
  0xd1   : > { %743 = vmatpush.msrb.mxu2 %v2808_v16  ;;  %709 = vmatpush.msra.mxu0 %v2811_v41  ;;  %3844 = vst [vmem:[#allocation21_spill] sm:$0xff] %v2855_v47 }
  0xd2   : > { %991 = vmatpush.msra.mxu1 %v2811_v41  ;;  %3845 = vst [vmem:[#allocation22_spill] sm:$0xff] %v2860_v5 }
  0xd3   : > { %744 = vmatpush.msrb.mxu2 %v2820_v19  ;;  %v419_v38 = vpop.permute.xlu0 %418  ;;  %v423_v48 = vpop.permute.xlu1 %422 }
  0xd4   : > { %v431_v7 = vsel %vm428_vm8, %v423_v48, %v419_v38  ;;  %v429_v39 = vsel %vm428_vm8, %v419_v38, %v423_v48  ;;  %v2303_v48 = vld [vmem:[%s3754_s1 + $0x10] ss:$8 sm:$0x3] }
  0xd5   : > { %v2839_v42 = vmul.f32 %v435_v57, %v431_v7  ;;  %745 = vmatpush.msrb.mxu2 %v2829_v44  ;;  %v2866_v52 = vmul.f32 %v436_v8, %v429_v39  ;;  %v903_v21 = vperm.slane %v2303_v48, 0  ;;  %v904_v7 = vperm.slane %v2303_v48, 1 }
  0xd7   : > { %3842 = vst [vmem:[#allocation19_spill] sm:$0xff] %v2839_v42  ;;  %746 = vmatpush.msrb.mxu2 %v2837_v33  ;;  %710 = vmatpush.msra.mxu0 %v2839_v42 }
  0xd8   : > { %992 = vmatpush.msra.mxu1 %v2839_v42  ;;  %711 = vmatmul.f32.vlgmr.msra.gmra.mxu0 %v683_v45  ;;  %3846 = vst [vmem:[#allocation23_spill] sm:$0xff] %v2866_v52 }
  0xd9   : > { %747 = vmatpush.msrb.mxu2 %v2848_v14 }
  0xdb   : > { %748 = vmatpush.msrb.mxu2 %v2855_v47 }
  0xdd   : > { %749 = vmatpush.msrb.mxu2 %v2860_v5 }
  0xdf   : > { %750 = vmatpush.msrb.mxu2 %v2866_v52 }
  0xe0   : > { %751 = vmatmul.f32.vlgmr.msrb.gmra.mxu2 %v683_v45 }
  0xe1   : > { %1278 = vmatpush.msra.mxu2 %v2579_v20 }
  0xe3   : > { %1279 = vmatpush.msra.mxu2 %v2585_v22 }
  0xe5   : > { %1280 = vmatpush.msra.mxu2 %v2589_v23 }
  0xe7   : > { %1281 = vmatpush.msra.mxu2 %v2603_v27 }
  0xe9   : > { %1282 = vmatpush.msra.mxu2 %v2628_v35 }
  0xeb   : > { %1283 = vmatpush.msra.mxu2 %v2635_v37 }
  0xed   : > { %1284 = vmatpush.msra.mxu2 %v2464_v0 }
  0xef   : > { %1285 = vmatpush.msra.mxu2 %v2467_v1 }
  0xf1   : > { %1286 = vmatpush.msra.mxu2 %v2655_v43 }
  0xf3   : > { %1287 = vmatpush.msra.mxu2 %v2682_v51 }
  0xf5   : > { %1288 = vmatpush.msra.mxu2 %v2687_v53 }
  0xf7   : > { %1289 = vmatpush.msra.mxu2 %v2719_v10 }
  0xf9   : > { %1290 = vmatpush.msra.mxu2 %v2771_v24 }
  0xfb   : > { %1291 = vmatpush.msra.mxu2 %v2801_v12 }
  0xfd   : > { %1292 = vmatpush.msra.mxu2 %v2811_v41 }
  0xff   : > { %1293 = vmatpush.msra.mxu2 %v2839_v42 }
 0x120   : > { %v689_v54 = vpop.permute.xlu2 %688 }
 0x144   : > { %v772_v57 = vpop.f32.mrf.mxu3 }
 0x145   : > { %v732_v25 = vpop.f32.mrf.mxu2 }
 0x155   : > { %v712_v0 = vpop.f32.mrf.mxu0 }
 0x156   : > { %v713_v1 = vadd.f32 %v712_v0, %v689_v54  ;;  %v2301_v0 = vld [vmem:[%s3754_s1 + $0x6] ss:$8 sm:$0x3] }
 0x158   : > { %v733_v6 = vadd.f32 %v732_v25, %v713_v1  ;;  %v887_v25 = vperm.slane %v2302_v50, 0  ;;  %v888_v1 = vperm.slane %v2302_v50, 1 }
 0x15a   : > { %vm775_vm9 = vcmp.ge.f32.partialorder %v733_v6, 0.0  ;;  %v777_v56 = vmul.f32 0.2, %v733_v6 }
 0x15c   : > { %v2886_v18 = vsel %vm775_vm9, %v733_v6, %v777_v56  ;;  %v2300_v6 = vld [vmem:[%s3754_s1 + $0x5] ss:$8 sm:$0x3]  ;;  %vm1633_vm9 = vcmask 850944  }
 0x15d   : > { %863 = vrot.lane.b32.xlu1 %v2886_v18, %s2372_s28  ;;  %879 = vrot.lane.b32.xlu2 %v2886_v18, %s2371_s27 }
 0x15e   : > { %895 = vrot.lane.b32.xlu0 %v2886_v18, %s2376_s14 }
 0x163   : > { %v752_v32 = vpop.f32.mrf.mxu2 }
 0x164   : > { %v753_v58 = vadd.f32 %v752_v32, %v689_v54  ;;  %v871_v32 = vperm.slane %v2301_v0, 0 }
 0x165   : > { %813 = vrot.lane.b32.xlu1 %v2886_v18, %s2375_s13  ;;  %829 = vrot.lane.b32.xlu2 %v2886_v18, %s2374_s30 }
 0x166   : > { %v773_v59 = vadd.f32 %v772_v57, %v753_v58  ;;  %847 = vrot.lane.b32.xlu0 %v2886_v18, %s2373_s29  ;;  %v872_v57 = vperm.slane %v2301_v0, 1 }
 0x168   : > { %v778_v62 = vmul.f32 0.2, %v773_v59  ;;  %vm776_vm10 = vcmp.ge.f32.partialorder %v773_v59, 0.0 }
 0x16a   : > { %v2900_v63 = vsel %vm776_vm10, %v773_v59, %v778_v62 }
 0x16b   : > { %3847 = vst [vmem:[#allocation24_spill] sm:$0xff] %v2900_v63 }
 0x16d   : > { %865 = vrot.lane.b32.xlu2 %v2900_v63, %s2372_s28  ;;  %897 = vrot.lane.b32.xlu1 %v2900_v63, %s2376_s14 }
 0x16e   : > { %797 = vrot.lane.b32.xlu0 %v2886_v18, %s2377_s15 }
 0x175   : > { %815 = vrot.lane.b32.xlu2 %v2900_v63, %s2375_s13  ;;  %849 = vrot.lane.b32.xlu1 %v2900_v63, %s2373_s29 }
 0x176   : > { %881 = vrot.lane.b32.xlu0 %v2900_v63, %s2371_s27 }
 0x17d   : > { %781 = vrot.lane.b32.xlu2 %v2886_v18, %s3771_s16  ;;  %799 = vrot.lane.b32.xlu1 %v2900_v63, %s2377_s15 }
 0x17e   : > { %831 = vrot.lane.b32.xlu0 %v2900_v63, %s2374_s30 }
 0x186   : > { %783 = vrot.lane.b32.xlu0 %v2900_v63, %s3771_s16 }
 0x1b7   : > { %v880_v40 = vpop.permute.xlu2 %879 }
 0x1bf   : > { %v830_v38 = vpop.permute.xlu2 %829 }
 0x1c7   : > { %v866_v54 = vpop.permute.xlu2 %865 }
 0x1cf   : > { %v864_v36 = vpop.permute.xlu1 %863 }
 0x1d0   : > { %v896_v17 = vpop.permute.xlu0 %895  ;;  %v867_v59 = vsel %vm571_vm1, %v864_v36, %v866_v54  ;;  %v868_v62 = vsel %vm571_vm1, %v866_v54, %v864_v36  ;;  %v2299_v36 = vld [vmem:[%s3754_s1 + $0x3] ss:$8 sm:$0x3] }
 0x1d1   : > { %v2963_v54 = vmul.f32 %v871_v32, %v867_v59  ;;  %v2965_v0 = vmul.f32 %v872_v57, %v868_v62  ;;  %v838_v32 = vperm.slane %v2299_v36, 1  ;;  %v2297_v57 = vld [vmem:[%s3754_s1 + $0x1] ss:$8 sm:$0x3] }
 0x1d2   : > { %v806_v42 = vperm.slane %v2297_v57, 1 }
 0x1d3   : > { %3848 = vst [vmem:[#allocation25_spill] sm:$0xff] %v2965_v0 }
 0x1d7   : > { %v814_v29 = vpop.permute.xlu1 %813 }
 0x1d8   : > { %v848_v46 = vpop.permute.xlu0 %847 }
 0x1df   : > { %v898_v45 = vpop.permute.xlu1 %897 }
 0x1e0   : > { %v798_v9 = vpop.permute.xlu0 %797  ;;  %v899_v8 = vsel %vm627_vm5, %v896_v17, %v898_v45  ;;  %v900_v15 = vsel %vm627_vm5, %v898_v45, %v896_v17  ;;  %v855_v45 = vperm.slane %v2300_v6, 0 }
 0x1e1   : > { %v2929_v39 = vmul.f32 %v903_v21, %v899_v8  ;;  %v2931_v49 = vmul.f32 %v904_v7, %v900_v15  ;;  %v856_v8 = vperm.slane %v2300_v6, 1 }
 0x1e3   : > { %1002 = vmatpush.msrb.mxu3 %v2929_v39  ;;  %1042 = vmatpush.msrb.mxu0 %v2931_v49 }
 0x1e7   : > { %v850_v56 = vpop.permute.xlu1 %849 }
 0x1e8   : > { %v882_v58 = vpop.permute.xlu0 %881  ;;  %v851_v15 = vsel %vm543_vm2, %v848_v46, %v850_v56  ;;  %v852_v50 = vsel %vm543_vm2, %v850_v56, %v848_v46  ;;  %v2975_v46 = vld [vmem:[%s3757_s4] sm:$0xff]  ;;  %v837_v56 = vperm.slane %v2299_v36, 0 }
 0x1e9   : > { %v883_v17 = vsel %vm599_vm0, %v880_v40, %v882_v58  ;;  %v884_v48 = vsel %vm599_vm0, %v882_v58, %v880_v40  ;;  %v2298_v40 = vld [vmem:[%s3754_s1 + $0x2] ss:$8 sm:$0x3]  ;;  %v2979_v6 = vmul.f32 %v856_v8, %v852_v50  ;;  %993 = vmatmul.f32.vlgmr.msra.gmra.mxu1 %v2975_v46 }
 0x1ea   : > { %v2952_v21 = vmul.f32 %v887_v25, %v883_v17  ;;  %v2954_v7 = vmul.f32 %v888_v1, %v884_v48  ;;  %v816_v25 = vpop.permute.xlu2 %815  ;;  %v2977_v1 = vmul.f32 %v855_v45, %v851_v15  ;;  %v821_v58 = vperm.slane %v2298_v40, 0 }
 0x1eb   : > { %3849 = vst [vmem:[#allocation26_spill] sm:$0xff] %v2979_v6  ;;  %v822_v59 = vperm.slane %v2298_v40, 1  ;;  %v817_v48 = vsel %vm483_vm4, %v814_v29, %v816_v25  ;;  %v818_v45 = vsel %vm483_vm4, %v816_v25, %v814_v29  ;;  %v805_v40 = vperm.slane %v2297_v57, 0 }
 0x1ec   : > { %1003 = vmatpush.msrb.mxu3 %v2952_v21  ;;  %1043 = vmatpush.msrb.mxu0 %v2954_v7  ;;  %v3010_v25 = vmul.f32 %v821_v58, %v818_v45  ;;  %v967_v58 = vld [vmem:[%s3758_s5] sm:$0xff] }
 0x1ed   : > { %970 = vperm.xlu1 %2357, %v967_v58  }
 0x1ee   : > { %1004 = vmatpush.msrb.mxu3 %v2963_v54  ;;  %1044 = vmatpush.msrb.mxu0 %v2965_v0 }
 0x1ef   : > { %v800_v17 = vpop.permute.xlu1 %799 }
 0x1f0   : > { %v832_v62 = vpop.permute.xlu0 %831  ;;  %1005 = vmatpush.msrb.mxu3 %v2977_v1  ;;  %1045 = vmatpush.msrb.mxu0 %v2979_v6  ;;  %v801_v41 = vsel %vm455_vm7, %v798_v9, %v800_v17  ;;  %v802_v29 = vsel %vm455_vm7, %v800_v17, %v798_v9 }
 0x1f1   : > { %v833_v8 = vsel %vm511_vm3, %v830_v38, %v832_v62  ;;  %v834_v15 = vsel %vm511_vm3, %v832_v62, %v830_v38  ;;  %v787_v38 = vld [vmem:[%s3754_s1] ss:$8 sm:$0x3]  ;;  %v3018_v57 = vmul.f32 %v806_v42, %v801_v41 }
 0x1f2   : > { %v2997_v50 = vmul.f32 %v837_v56, %v834_v15  ;;  %v2999_v36 = vmul.f32 %v838_v32, %v833_v8  ;;  %1006 = vmatpush.msrb.mxu3 %v2886_v18  ;;  %1046 = vmatpush.msrb.mxu0 %v2900_v63  ;;  %v3012_v56 = vmul.f32 %v822_v59, %v817_v48  ;;  %v789_v9 = vperm.slane %v787_v38, 0  ;;  %v782_v59 = vpop.permute.xlu2 %781  ;;  %v966_v8 = vld [vmem:[%s3757_s4 + $0x8] sm:$0xff] }
 0x1f3   : > { %v3016_v32 = vmul.f32 %v805_v40, %v802_v29  ;;  %v790_v62 = vperm.slane %v787_v38, 1 }
 0x1f4   : > { %3850 = vst [vmem:[#allocation27_spill] sm:$0xff] %v2999_v36  ;;  %1007 = vmatpush.msrb.mxu3 %v2997_v50  ;;  %1047 = vmatpush.msrb.mxu0 %v2999_v36 }
 0x1f6   : > { %1008 = vmatpush.msrb.mxu3 %v3010_v25  ;;  %1048 = vmatpush.msrb.mxu0 %v3012_v56 }
 0x1f8   : > { %v784_v17 = vpop.permute.xlu0 %783  ;;  %1009 = vmatpush.msrb.mxu3 %v3016_v32  ;;  %1049 = vmatpush.msrb.mxu0 %v3018_v57 }
 0x1f9   : > { %v785_v41 = vsel %vm428_vm8, %v782_v59, %v784_v17  ;;  %v786_v42 = vsel %vm428_vm8, %v784_v17, %v782_v59 }
 0x1fa   : > { %v3031_v48 = vmul.f32 %v789_v9, %v786_v42  ;;  %v3033_v45 = vmul.f32 %v790_v62, %v785_v41 }
 0x1fc   : > { %1010 = vmatpush.msrb.mxu3 %v3031_v48  ;;  %1050 = vmatpush.msrb.mxu0 %v3033_v45 }
 0x1fe   : > { %1011 = vmatpush.msrb.mxu3 %v2698_v60  ;;  %1051 = vmatpush.msrb.mxu0 %v2700_v61 }
 0x200   : > { %1012 = vmatpush.msrb.mxu3 %v2721_v26  ;;  %1052 = vmatpush.msrb.mxu0 %v2723_v30 }
 0x201   : > { %2305 = vmatmul.msk.f32.vlgmr.msrb.gmra.mxu0 %vm973_vm11, %v966_v8  ;;  %2304 = vmatmul.msk.f32.vlgmr.msrb.gmra.mxu3 %vm973_vm11, %v966_v8 }
 0x202   : > { %1017 = vmatpush.msra.mxu3 %v2735_v34 }
 0x204   : > { %1018 = vmatpush.msra.mxu3 %v2750_v13 }
 0x206   : > { %1019 = vmatpush.msra.mxu3 %v2759_v4 }
 0x208   : > { %1020 = vmatpush.msra.mxu3 %v2769_v55 }
 0x20a   : > { %1021 = vmatpush.msra.mxu3 %v2778_v28 }
 0x20c   : > { %1022 = vmatpush.msra.mxu3 %v2786_v31 }
 0x20e   : > { %1023 = vmatpush.msra.mxu3 %v2476_v2 }
 0x210   : > { %1024 = vmatpush.msra.mxu3 %v2479_v3 }
 0x212   : > { %1025 = vmatpush.msra.mxu3 %v2808_v16 }
 0x214   : > { %1026 = vmatpush.msra.mxu3 %v2820_v19 }
 0x216   : > { %1027 = vmatpush.msra.mxu3 %v2829_v44 }
 0x218   : > { %1028 = vmatpush.msra.mxu3 %v2837_v33 }
 0x21a   : > { %1029 = vmatpush.msra.mxu3 %v2848_v14 }
 0x21c   : > { %1030 = vmatpush.msra.mxu3 %v2855_v47 }
 0x21e   : > { %1031 = vmatpush.msra.mxu3 %v2860_v5 }
 0x220   : > { %1032 = vmatpush.msra.mxu3 %v2866_v52 }
 0x221   : > { %1033 = vmatmul.f32.vlgmr.msra.gmra.mxu3 %v2975_v46 }
 0x222   : > { %1338 = vmatpush.msrb.mxu3 %v2735_v34 }
 0x224   : > { %1339 = vmatpush.msrb.mxu3 %v2750_v13 }
 0x226   : > { %1340 = vmatpush.msrb.mxu3 %v2759_v4 }
 0x228   : > { %1341 = vmatpush.msrb.mxu3 %v2769_v55 }
 0x22a   : > { %1342 = vmatpush.msrb.mxu3 %v2778_v28 }
 0x22c   : > { %1343 = vmatpush.msrb.mxu3 %v2786_v31 }
 0x22e   : > { %1344 = vmatpush.msrb.mxu3 %v2476_v2 }
 0x230   : > { %1345 = vmatpush.msrb.mxu3 %v2479_v3 }
 0x232   : > { %1346 = vmatpush.msrb.mxu3 %v2808_v16 }
 0x234   : > { %1347 = vmatpush.msrb.mxu3 %v2820_v19 }
 0x236   : > { %1348 = vmatpush.msrb.mxu3 %v2829_v44 }
 0x238   : > { %1349 = vmatpush.msrb.mxu3 %v2837_v33 }
 0x23a   : > { %1350 = vmatpush.msrb.mxu3 %v2848_v14 }
 0x23c   : > { %1351 = vmatpush.msrb.mxu3 %v2855_v47 }
 0x23e   : > { %1352 = vmatpush.msrb.mxu3 %v2860_v5 }
 0x240   : > { %1353 = vmatpush.msrb.mxu3 %v2866_v52 }
 0x25f   : > { %v971_v2 = vpop.permute.xlu1 %970 }
 0x266   : > { %v994_v46 = vpop.f32.mrf.mxu1 }
 0x267   : > { %v995_v15 = vadd.f32 %v994_v46, %v971_v2 }
 0x27e   : > { %v1054_v62 = vpop.f32.mrf.mxu0 }
 0x284   : > { %v1014_v3 = vpop.f32.mrf.mxu3 }
 0x285   : > { %v1015_v40 = vadd.f32 %v1014_v3, %v995_v15 }
 0x287   : > { %vm1057_vm12 = vcmp.ge.f32.partialorder %v1015_v40, 0.0  ;;  %v1059_v29 = vmul.f32 0.2, %v1015_v40 }
 0x289   : > { %v3077_v38 = vsel %vm1057_vm12, %v1015_v40, %v1059_v29  ;;  %v2308_v40 = vld [vmem:[%s3754_s1 + $0x3] ss:$8 sm:$0x3]  ;;  %v2307_v29 = vld [vmem:[%s3754_s1 + $0x2] ss:$8 sm:$0x3] }
 0x28a   : > { %1095 = vrot.lane.b32.xlu1 %v3077_v38, %s2375_s13  ;;  %1079 = vrot.lane.b32.xlu0 %v3077_v38, %s2377_s15 }
 0x28b   : > { %1111 = vrot.lane.b32.xlu2 %v3077_v38, %s2374_s30  ;;  %1298 = vmatpush.msrb.mxu1 %v3077_v38 }
 0x2a4   : > { %v1034_v9 = vpop.f32.mrf.mxu3 }
 0x2a5   : > { %v1035_v58 = vadd.f32 %v1034_v9, %v971_v2  ;;  %v1265_v2 = vld [vmem:[%s3759_s6] sm:$0xff]  ;;  %v1119_v9 = vperm.slane %v2308_v40, 0 }
 0x2a6   : > { %1294 = vmatmul.f32.vlgmr.msra.gmra.mxu2 %v1265_v2  ;;  %1354 = vmatmul.f32.vlgmr.msrb.gmra.mxu3 %v1265_v2  ;;  %v1104_v2 = vperm.slane %v2307_v29, 1 }
 0x2a7   : > { %v1055_v59 = vadd.f32 %v1054_v62, %v1035_v58  ;;  %v1120_v62 = vperm.slane %v2308_v40, 1 }
 0x2a9   : > { %vm1058_vm13 = vcmp.ge.f32.partialorder %v1055_v59, 0.0  ;;  %v1060_v17 = vmul.f32 0.2, %v1055_v59 }
 0x2ab   : > { %v3086_v41 = vsel %vm1058_vm13, %v1055_v59, %v1060_v17  ;;  %v2306_v59 = vld [vmem:[%s3754_s1 + $0x1] ss:$8 sm:$0x3]  ;;  %v1103_v17 = vperm.slane %v2307_v29, 0 }
 0x2ac   : > { %3851 = vst [vmem:[#allocation28_spill] sm:$0xff] %v3086_v41  ;;  %1358 = vmatpush.msra.mxu0 %v3086_v41  ;;  %1113 = vrot.lane.b32.xlu0 %v3086_v41, %s2374_s30  ;;  %v1087_v47 = vperm.slane %v2306_v59, 0  ;;  %v1088_v29 = vperm.slane %v2306_v59, 1  ;;  %v1268_v59 = vld [vmem:[%s3760_s7] sm:$0xff] }
 0x2ad   : > { %1081 = vrot.lane.b32.xlu1 %v3086_v41, %s2377_s15  ;;  %1097 = vrot.lane.b32.xlu2 %v3086_v41, %s2375_s13 }
 0x2b4   : > { %1065 = vrot.lane.b32.xlu0 %v3086_v41, %s3771_s16 }
 0x2b5   : > { %1177 = vrot.lane.b32.xlu1 %v3077_v38, %s2376_s14  ;;  %1063 = vrot.lane.b32.xlu2 %v3077_v38, %s3771_s16 }
 0x2bc   : > { %1161 = vrot.lane.b32.xlu0 %v3077_v38, %s2371_s27 }
 0x2bd   : > { %1163 = vrot.lane.b32.xlu1 %v3086_v41, %s2371_s27  ;;  %1145 = vrot.lane.b32.xlu2 %v3077_v38, %s2372_s28 }
 0x2c4   : > { %1147 = vrot.lane.b32.xlu0 %v3086_v41, %s2372_s28 }
 0x2c5   : > { %1129 = vrot.lane.b32.xlu1 %v3077_v38, %s2373_s29  ;;  %1179 = vrot.lane.b32.xlu2 %v3086_v41, %s2376_s14 }
 0x2cc   : > { %1271 = vperm.xlu0 %2358, %v1268_v59  }
 0x2cd   : > { %1131 = vrot.lane.b32.xlu2 %v3086_v41, %s2373_s29 }
 0x2e5   : > { %v1112_v42 = vpop.permute.xlu2 %1111 }
 0x2fc   : > { %v1080_v15 = vpop.permute.xlu0 %1079  ;;  %v1096_v3 = vpop.permute.xlu1 %1095 }
 0x307   : > { %v1098_v8 = vpop.permute.xlu2 %1097 }
 0x308   : > { %v1099_v12 = vsel %vm483_vm4, %v1096_v3, %v1098_v8  ;;  %v1100_v24 = vsel %vm483_vm4, %v1098_v8, %v1096_v3  ;;  %v1069_v8 = vld [vmem:[%s3754_s1] ss:$8 sm:$0x3] }
 0x309   : > { %v3148_v3 = vmul.f32 %v1103_v17, %v1100_v24  ;;  %v1071_v24 = vperm.slane %v1069_v8, 0 }
 0x30f   : > { %v1064_v46 = vpop.permute.xlu2 %1063 }
 0x317   : > { %v3124_v58 = vpop.permute.xlu2 %1145 }
 0x31e   : > { %v1114_v41 = vpop.permute.xlu0 %1113 }
 0x31f   : > { %v1115_v52 = vsel %vm511_vm3, %v1112_v42, %v1114_v41  ;;  %v1116_v40 = vsel %vm511_vm3, %v1114_v41, %v1112_v42  ;;  %v1082_v10 = vpop.permute.xlu1 %1081  ;;  %v3150_v41 = vmul.f32 %v1104_v2, %v1099_v12  ;;  %v1072_v12 = vperm.slane %v1069_v8, 1 }
 0x320   : > { %v3137_v5 = vmul.f32 %v1119_v9, %v1116_v40  ;;  %v3139_v53 = vmul.f32 %v1120_v62, %v1115_v52  ;;  %v1083_v51 = vsel %vm455_vm7, %v1080_v15, %v1082_v10  ;;  %v1084_v14 = vsel %vm455_vm7, %v1082_v10, %v1080_v15  ;;  %v3157_v52 = vld [vmem:[%s3754_s1 + $0x10] ss:$8 sm:$0x3]  ;;  %v1180_v62 = vpop.permute.xlu2 %1179 }
 0x321   : > { %v3159_v42 = vmul.f32 %v1087_v47, %v1084_v14  ;;  %v3161_v10 = vmul.f32 %v1088_v29, %v1083_v51  ;;  %v1186_v15 = vperm.slane %v3157_v52, 1 }
 0x322   : > { %1299 = vmatpush.msrb.mxu1 %v3137_v5  ;;  %1359 = vmatpush.msra.mxu0 %v3139_v53 }
 0x324   : > { %1300 = vmatpush.msrb.mxu1 %v3148_v3  ;;  %1360 = vmatpush.msra.mxu0 %v3150_v41 }
 0x326   : > { %v1066_v9 = vpop.permute.xlu0 %1065  ;;  %1361 = vmatpush.msra.mxu0 %v3161_v10  ;;  %1301 = vmatpush.msrb.mxu1 %v3159_v42 }
 0x327   : > { %v1067_v14 = vsel %vm428_vm8, %v1064_v46, %v1066_v9  ;;  %v1068_v51 = vsel %vm428_vm8, %v1066_v9, %v1064_v46  ;;  %v1178_v47 = vpop.permute.xlu1 %1177  ;;  %v2311_v46 = vld [vmem:[%s3754_s1 + $0x7] ss:$8 sm:$0x3] }
 0x328   : > { %v3175_v17 = vmul.f32 %v1071_v24, %v1068_v51  ;;  %v3177_v2 = vmul.f32 %v1072_v12, %v1067_v14  ;;  %v1182_v40 = vsel %vm627_vm5, %v1180_v62, %v1178_v47  ;;  %v1170_v8 = vperm.slane %v2311_v46, 1  ;;  %v2310_v14 = vld [vmem:[%s3754_s1 + $0x6] ss:$8 sm:$0x3] }
 0x329   : > { %v3181_v29 = vmul.f32 %v1186_v15, %v1182_v40  ;;  %v2309_v51 = vld [vmem:[%s3754_s1 + $0x5] ss:$8 sm:$0x3]  ;;  %v1154_v59 = vperm.slane %v2310_v14, 1 }
 0x32a   : > { %1302 = vmatpush.msrb.mxu1 %v3175_v17  ;;  %1362 = vmatpush.msra.mxu0 %v3177_v2 }
 0x32b   : > { %3852 = vst [vmem:[#allocation29_spill] sm:$0xff] %v3181_v29  ;;  %1390 = vmatpush.msrb.mxu2 %v3181_v29 }
 0x32c   : > { %1303 = vmatpush.msrb.mxu1 %v2929_v39  ;;  %1363 = vmatpush.msra.mxu0 %v2931_v49 }
 0x32e   : > { %v1162_v24 = vpop.permute.xlu0 %1161  ;;  %1304 = vmatpush.msrb.mxu1 %v2952_v21  ;;  %1364 = vmatpush.msra.mxu0 %v2954_v7 }
 0x32f   : > { %v1164_v12 = vpop.permute.xlu1 %1163 }
 0x330   : > { %v1166_v15 = vsel %vm599_vm0, %v1164_v12, %v1162_v24  ;;  %1305 = vmatpush.msrb.mxu1 %v2963_v54  ;;  %1365 = vmatpush.msra.mxu0 %v2965_v0 }
 0x331   : > { %v3197_v9 = vmul.f32 %v1170_v8, %v1166_v15  ;;  %v1138_v8 = vperm.slane %v2309_v51, 1  ;;  %v1132_v15 = vpop.permute.xlu2 %1131 }
 0x332   : > { %1306 = vmatpush.msrb.mxu1 %v2977_v1  ;;  %1366 = vmatpush.msra.mxu0 %v2979_v6 }
 0x333   : > { %3853 = vst [vmem:[#allocation30_spill] sm:$0xff] %v3197_v9  ;;  %1391 = vmatpush.msrb.mxu2 %v3197_v9 }
 0x334   : > { %1307 = vmatpush.msrb.mxu1 %v2886_v18  ;;  %1367 = vmatpush.msra.mxu0 %v2900_v63 }
 0x336   : > { %v1148_v40 = vpop.permute.xlu0 %1147  ;;  %1308 = vmatpush.msrb.mxu1 %v2997_v50  ;;  %1368 = vmatpush.msra.mxu0 %v2999_v36  ;;  %v1267_v36 = vld [vmem:[%s3759_s6 + $0x10] sm:$0xff] }
 0x337   : > { %v1150_v9 = vsel %vm571_vm1, %v1148_v40, %v3124_v58  ;;  %v1130_v29 = vpop.permute.xlu1 %1129 }
 0x338   : > { %v3215_v6 = vmul.f32 %v1154_v59, %v1150_v9  ;;  %v1134_v0 = vsel %vm543_vm2, %v1132_v15, %v1130_v29  ;;  %1309 = vmatpush.msrb.mxu1 %v3010_v25  ;;  %1369 = vmatpush.msra.mxu0 %v3012_v56  ;;  %v1185_v9 = vperm.slane %v3157_v52, 0  ;;  %v1169_v59 = vperm.slane %v2311_v46, 0  ;;  %v1266_v52 = vld [vmem:[%s3759_s6 + $0x8] sm:$0xff] }
 0x339   : > { %v3221_v63 = vmul.f32 %v1138_v8, %v1134_v0  ;;  %v1181_v0 = vsel %vm627_vm5, %v1178_v47, %v1180_v62  ;;  %v1165_v8 = vsel %vm599_vm0, %v1162_v24, %v1164_v12  ;;  %v1153_v62 = vperm.slane %v2310_v14, 0  ;;  %v3304_v14 = vld [vmem:[%s2461_s26] sm:$0xff] }
 0x33a   : > { %3854 = vst [vmem:[#allocation31_spill] sm:$0xff] %v3215_v6  ;;  %1310 = vmatpush.msrb.mxu1 %v3016_v32  ;;  %1392 = vmatpush.msrb.mxu2 %v3215_v6  ;;  %v1149_v47 = vsel %vm571_vm1, %v3124_v58, %v1148_v40  ;;  %v3252_v46 = vmul.f32 %v1169_v59, %v1165_v8  ;;  %v1137_v6 = vperm.slane %v2309_v51, 0  ;;  %v3858_v51 = vld [vmem:[#allocation20_spill] sm:$0xff]  ;;  %v3859_v40 = vld [vmem:[#allocation3_spill] sm:$0xff]  ;;  %v3863_v59 = vld [vmem:[#allocation5_spill] sm:$0xff] }
 0x33b   : > { %3855 = vst [vmem:[#allocation32_spill] sm:$0xff] %v3221_v63  ;;  %1370 = vmatpush.msra.mxu0 %v3018_v57  ;;  %v1133_v24 = vsel %vm543_vm2, %v1130_v29, %v1132_v15  ;;  %v3259_v12 = vmul.f32 %v1153_v62, %v1149_v47  ;;  %v3298_v29 = vld [vmem:[%s2461_s26 + $0x10] sm:$0xff]  ;;  %v3865_v8 = vld [vmem:[#allocation10_spill] sm:$0xff]  ;;  %v3867_v47 = vld [vmem:[#allocation15_spill] sm:$0xff] }
 0x33c   : > { %1311 = vmatpush.msrb.mxu1 %v3031_v48  ;;  %1393 = vmatpush.msrb.mxu2 %v3221_v63  ;;  %v3244_v63 = vmul.f32 %v1185_v9, %v1181_v0  ;;  %v3264_v58 = vmul.f32 %v1137_v6, %v1133_v24  ;;  %v3282_v6 = vld [vmem:[%s2461_s26 + $0x18] sm:$0xff]  ;;  %v3860_v15 = vld [vmem:[#allocation21_spill] sm:$0xff]  ;;  %v3861_v9 = vld [vmem:[#allocation4_spill] sm:$0xff] }
 0x33d   : > { %1371 = vmatpush.msra.mxu0 %v3033_v45  ;;  %2314 = vmatmul.msk.f32.vlgmr.msrb.gmra.mxu2 %vm1274_vm14, %v1267_v36  ;;  %3856 = vst [vmem:[#allocation33_spill] sm:$0xff] %v3282_v6  ;;  %v3862_v0 = vld [vmem:[#allocation22_spill] sm:$0xff]  ;;  %v3866_v62 = vld [vmem:[#allocation13_spill] sm:$0xff]  ;;  %v3868_v24 = vld [vmem:[#allocation19_spill] sm:$0xff] }
 0x33e   : > { %1657 = vmatpush.msra.mxu2 %v3077_v38  ;;  %1312 = vmatpush.msrb.mxu1 %v2698_v60 }
 0x33f   : > { %1372 = vmatpush.msra.mxu0 %v2700_v61 }
 0x340   : > { %1658 = vmatpush.msra.mxu2 %v3137_v5  ;;  %1313 = vmatpush.msrb.mxu1 %v2721_v26 }
 0x341   : > { %1373 = vmatpush.msra.mxu0 %v2723_v30  ;;  %1314 = vmatmul.f32.vlgmr.msrb.gmra.mxu1 %v1266_v52 }
 0x342   : > { %1330 = vmatpush.msra.mxu1 %v3244_v63  ;;  %1374 = vmatmul.f32.vlgmr.msra.gmra.mxu0 %v1266_v52  ;;  %v3864_v52 = vld [vmem:[#allocation23_spill] sm:$0xff] }
 0x343   : > { %1659 = vmatpush.msra.mxu2 %v3148_v3  ;;  %1697 = vmatpush.msrb.mxu0 %v2735_v34 }
 0x344   : > { %1331 = vmatpush.msra.mxu1 %v3252_v46 }
 0x345   : > { %1660 = vmatpush.msra.mxu2 %v3159_v42  ;;  %1698 = vmatpush.msrb.mxu0 %v2750_v13 }
 0x346   : > { %1332 = vmatpush.msra.mxu1 %v3259_v12 }
 0x347   : > { %1661 = vmatpush.msra.mxu2 %v3175_v17  ;;  %1699 = vmatpush.msrb.mxu0 %v2759_v4 }
 0x348   : > { %1333 = vmatpush.msra.mxu1 %v3264_v58 }
 0x349   : > { %1662 = vmatpush.msra.mxu2 %v2929_v39  ;;  %1700 = vmatpush.msrb.mxu0 %v2769_v55 }
 0x34a   : > { %1637 = vmatpush.msrb.mxu1 %v2579_v20 }
 0x34b   : > { %2313 = vmatmul.msk.f32.vlgmr.msra.gmra.mxu1 %vm1274_vm14, %v1267_v36  ;;  %1663 = vmatpush.msra.mxu2 %v2952_v21  ;;  %v3288_v36 = vld [vmem:[%s2461_s26 + $0x8] sm:$0xff] }
 0x34c   : > { %1701 = vmatpush.msrb.mxu0 %v2778_v28  ;;  %1638 = vmatpush.msrb.mxu1 %v2585_v22  ;;  %3857 = vst [vmem:[#allocation34_spill] sm:$0xff] %v3288_v36 }
 0x34d   : > { %1664 = vmatpush.msra.mxu2 %v2963_v54 }
 0x34e   : > { %1702 = vmatpush.msrb.mxu0 %v2786_v31  ;;  %1639 = vmatpush.msrb.mxu1 %v2589_v23 }
 0x34f   : > { %1665 = vmatpush.msra.mxu2 %v2977_v1 }
 0x350   : > { %1703 = vmatpush.msrb.mxu0 %v3282_v6  ;;  %1640 = vmatpush.msrb.mxu1 %v2603_v27 }
 0x351   : > { %1666 = vmatpush.msra.mxu2 %v2886_v18 }
 0x352   : > { %1704 = vmatpush.msrb.mxu0 %v3288_v36  ;;  %1641 = vmatpush.msrb.mxu1 %v2628_v35 }
 0x353   : > { %1667 = vmatpush.msra.mxu2 %v2997_v50 }
 0x354   : > { %1705 = vmatpush.msrb.mxu0 %v2808_v16  ;;  %1642 = vmatpush.msrb.mxu1 %v2635_v37 }
 0x355   : > { %1668 = vmatpush.msra.mxu2 %v3010_v25 }
 0x356   : > { %1706 = vmatpush.msrb.mxu0 %v2820_v19  ;;  %1643 = vmatpush.msrb.mxu1 %v3298_v29  ;;  %v2320_v19 = vld [vmem:[%s3754_s1 + $0x7] ss:$8 sm:$0x3] }
 0x357   : > { %1669 = vmatpush.msra.mxu2 %v3016_v32  ;;  %v1510_v6 = vperm.slane %v2320_v19, 0 }
 0x358   : > { %1707 = vmatpush.msrb.mxu0 %v2829_v44  ;;  %1644 = vmatpush.msrb.mxu1 %v3304_v14 }
 0x359   : > { %1670 = vmatpush.msra.mxu2 %v3031_v48 }
 0x35a   : > { %1708 = vmatpush.msrb.mxu0 %v2837_v33  ;;  %1645 = vmatpush.msrb.mxu1 %v2655_v43 }
 0x35b   : > { %1671 = vmatpush.msra.mxu2 %v2698_v60 }
 0x35c   : > { %1709 = vmatpush.msrb.mxu0 %v3858_v51  ;;  %1646 = vmatpush.msrb.mxu1 %v3859_v40 }
 0x35d   : > { %1672 = vmatpush.msra.mxu2 %v2721_v26 }
 0x35e   : > { %1710 = vmatpush.msrb.mxu0 %v3860_v15  ;;  %1647 = vmatpush.msrb.mxu1 %v3861_v9 }
 0x360   : > { %1711 = vmatpush.msrb.mxu0 %v3862_v0  ;;  %1648 = vmatpush.msrb.mxu1 %v3863_v59  ;;  %v3869_v0 = vld [vmem:[#allocation28_spill] sm:$0xff] }
 0x362   : > { %1712 = vmatpush.msrb.mxu0 %v3864_v52  ;;  %1649 = vmatpush.msrb.mxu1 %v3865_v8 }
 0x364   : > { %2051 = vmatpush.msra.mxu0 %v3077_v38  ;;  %1650 = vmatpush.msrb.mxu1 %v3866_v62 }
 0x366   : > { %2052 = vmatpush.msra.mxu0 %v3137_v5  ;;  %1651 = vmatpush.msrb.mxu1 %v3867_v47  ;;  %v3870_v5 = vld [vmem:[#allocation25_spill] sm:$0xff] }
 0x368   : > { %2053 = vmatpush.msra.mxu0 %v3148_v3  ;;  %1652 = vmatpush.msrb.mxu1 %v3868_v24 }
 0x36a   : > { %2054 = vmatpush.msra.mxu0 %v3159_v42  ;;  %1717 = vmatpush.msra.mxu1 %v3869_v0 }
 0x36c   : > { %2055 = vmatpush.msra.mxu0 %v3175_v17  ;;  %1718 = vmatpush.msra.mxu1 %v3139_v53 }
 0x36e   : > { %2056 = vmatpush.msra.mxu0 %v2929_v39  ;;  %1719 = vmatpush.msra.mxu1 %v3150_v41  ;;  %v3871_v39 = vld [vmem:[#allocation26_spill] sm:$0xff] }
 0x370   : > { %2057 = vmatpush.msra.mxu0 %v2952_v21  ;;  %1720 = vmatpush.msra.mxu1 %v3161_v10  ;;  %v3872_v21 = vld [vmem:[#allocation24_spill] sm:$0xff] }
 0x372   : > { %2058 = vmatpush.msra.mxu0 %v2963_v54  ;;  %1721 = vmatpush.msra.mxu1 %v3177_v2  ;;  %v3873_v54 = vld [vmem:[#allocation27_spill] sm:$0xff] }
 0x374   : > { %2059 = vmatpush.msra.mxu0 %v2977_v1  ;;  %1722 = vmatpush.msra.mxu1 %v2931_v49  ;;  %v1295_v1 = vpop.f32.mrf.mxu2 }
 0x376   : > { %2060 = vmatpush.msra.mxu0 %v2886_v18  ;;  %1723 = vmatpush.msra.mxu1 %v2954_v7  ;;  %v1624_v18 = vld [vmem:[%s3761_s8] sm:$0xff] }
 0x377   : > { %1653 = vmatmul.f32.vlgmr.msrb.gmra.mxu1 %v1624_v18  ;;  %1713 = vmatmul.f32.vlgmr.msrb.gmra.mxu0 %v1624_v18 }
 0x378   : > { %2061 = vmatpush.msra.mxu0 %v2997_v50  ;;  %1724 = vmatpush.msra.mxu1 %v3870_v5  ;;  %v1272_v50 = vpop.permute.xlu0 %1271 }
 0x379   : > { %v1296_v52 = vadd.f32 %v1295_v1, %v1272_v50 }
 0x37a   : > { %2062 = vmatpush.msra.mxu0 %v3010_v25  ;;  %1725 = vmatpush.msra.mxu1 %v3871_v39 }
 0x37c   : > { %2063 = vmatpush.msra.mxu0 %v3016_v32  ;;  %1726 = vmatpush.msra.mxu1 %v3872_v21 }
 0x37e   : > { %2064 = vmatpush.msra.mxu0 %v3031_v48  ;;  %1727 = vmatpush.msra.mxu1 %v3873_v54 }
 0x380   : > { %2065 = vmatpush.msra.mxu0 %v2698_v60  ;;  %1728 = vmatpush.msra.mxu1 %v3012_v56  ;;  %v1625_v60 = vld [vmem:[%s3761_s8 + $0x8] sm:$0xff] }
 0x381   : > { %1673 = vmatmul.f32.vlgmr.msra.gmra.mxu2 %v1625_v60 }
 0x382   : > { %2066 = vmatpush.msra.mxu0 %v2721_v26  ;;  %1729 = vmatpush.msra.mxu1 %v3018_v57  ;;  %v1355_v26 = vpop.f32.mrf.mxu3 }
 0x383   : > { %v1356_v25 = vadd.f32 %v1355_v26, %v1272_v50 }
 0x384   : > { %1730 = vmatpush.msra.mxu1 %v3033_v45 }
 0x386   : > { %1731 = vmatpush.msra.mxu1 %v2700_v61 }
 0x388   : > { %1732 = vmatpush.msra.mxu1 %v2723_v30 }
 0x389   : > { %1733 = vmatmul.f32.vlgmr.msra.gmra.mxu1 %v1625_v60 }
 0x3be   : > { %v1315_v32 = vpop.f32.mrf.mxu1 }
 0x3bf   : > { %v1375_v48 = vpop.f32.mrf.mxu0  ;;  %v1316_v18 = vadd.f32 %v1315_v32, %v1296_v52  ;;  %v1627_v52 = vld [vmem:[%s3762_s9] sm:$0xff] }
 0x3c0   : > { %v1376_v38 = vadd.f32 %v1375_v48, %v1356_v25  ;;  %v1395_v3 = vpop.f32.mrf.mxu2 }
 0x3c2   : > { %v1396_v42 = vadd.f32 %v1395_v3, %v1376_v38 }
 0x3c4   : > { %vm1399_vm15 = vcmp.ge.f32.partialorder %v1396_v42, 0.0  ;;  %v1401_v17 = vmul.f32 0.2, %v1396_v42 }
 0x3c6   : > { %v3361_v15 = vsel %vm1399_vm15, %v1396_v42, %v1401_v17  ;;  %v2321_v17 = vld [vmem:[%s3754_s1 + $0x10] ss:$8 sm:$0x3] }
 0x3c7   : > { %1472 = vrot.lane.b32.xlu0 %v3361_v15, %s2373_s29  ;;  %1488 = vrot.lane.b32.xlu1 %v3361_v15, %s2372_s28 }
 0x3c8   : > { %1520 = vrot.lane.b32.xlu2 %v3361_v15, %s2376_s14  ;;  %v1335_v60 = vpop.f32.mrf.mxu1 }
 0x3c9   : > { %v1336_v26 = vadd.f32 %v1335_v60, %v1316_v18  ;;  %v1526_v60 = vperm.slane %v2321_v17, 0 }
 0x3cb   : > { %vm1398_vm6 = vcmp.ge.f32.partialorder %v1336_v26, 0.0  ;;  %v1400_v25 = vmul.f32 0.2, %v1336_v26 }
 0x3cd   : > { %v3369_v48 = vsel %vm1398_vm6, %v1336_v26, %v1400_v25  ;;  %v1527_v26 = vperm.slane %v2321_v17, 1  ;;  %v2319_v17 = vld [vmem:[%s3754_s1 + $0x6] ss:$8 sm:$0x3] }
 0x3cf   : > { %1438 = vrot.lane.b32.xlu1 %v3361_v15, %s2375_s13  ;;  %1486 = vrot.lane.b32.xlu0 %v3369_v48, %s2372_s28 }
 0x3d0   : > { %1504 = vrot.lane.b32.xlu2 %v3361_v15, %s2371_s27 }
 0x3d7   : > { %1436 = vrot.lane.b32.xlu0 %v3369_v48, %s2375_s13  ;;  %1518 = vrot.lane.b32.xlu1 %v3369_v48, %s2376_s14 }
 0x3d8   : > { %1454 = vrot.lane.b32.xlu2 %v3361_v15, %s2374_s30 }
 0x3df   : > { %1422 = vrot.lane.b32.xlu0 %v3361_v15, %s2377_s15  ;;  %1502 = vrot.lane.b32.xlu1 %v3369_v48, %s2371_s27 }
 0x3e0   : > { %1470 = vrot.lane.b32.xlu2 %v3369_v48, %s2373_s29 }
 0x3e7   : > { %1630 = vperm.xlu0 %2358, %v1627_v52   ;;  %1452 = vrot.lane.b32.xlu1 %v3369_v48, %s2374_s30 }
 0x3e8   : > { %1420 = vrot.lane.b32.xlu2 %v3369_v48, %s2377_s15 }
 0x3ef   : > { %1404 = vrot.lane.b32.xlu1 %v3369_v48, %s3874_s25 }
 0x3f0   : > { %1406 = vrot.lane.b32.xlu2 %v3361_v15, %s3874_s25 }
 0x422   : > { %v1521_v1 = vpop.permute.xlu2 %1520 }
 0x42a   : > { %v1505_v50 = vpop.permute.xlu2 %1504 }
 0x432   : > { %v1455_v42 = vpop.permute.xlu2 %1454 }
 0x439   : > { %v1489_v32 = vpop.permute.xlu1 %1488  ;;  %v1473_v38 = vpop.permute.xlu0 %1472 }
 0x43a   : > { %v1471_v16 = vpop.permute.xlu2 %1470 }
 0x441   : > { %v1439_v3 = vpop.permute.xlu1 %1438  ;;  %v1487_v18 = vpop.permute.xlu0 %1486 }
 0x442   : > { %v1491_v31 = vsel %vm571_vm1, %v1489_v32, %v1487_v18 }
 0x449   : > { %v1519_v25 = vpop.permute.xlu1 %1518  ;;  %v1437_v36 = vpop.permute.xlu0 %1436 }
 0x44a   : > { %v1522_v52 = vsel %vm627_vm5, %v1519_v25, %v1521_v1  ;;  %v1523_v51 = vsel %vm627_vm5, %v1521_v1, %v1519_v25  ;;  %v1511_v1 = vperm.slane %v2320_v19, 1 }
 0x44b   : > { %v3407_v33 = vmul.f32 %v1526_v60, %v1522_v52  ;;  %v3409_v44 = vmul.f32 %v1527_v26, %v1523_v51  ;;  %v2318_v51 = vld [vmem:[%s3754_s1 + $0x5] ss:$8 sm:$0x3]  ;;  %v1494_v60 = vperm.slane %v2319_v17, 0  ;;  %v1495_v26 = vperm.slane %v2319_v17, 1 }
 0x44c   : > { %v1490_v52 = vsel %vm571_vm1, %v1487_v18, %v1489_v32  ;;  %v1478_v19 = vperm.slane %v2318_v51, 0  ;;  %v1479_v4 = vperm.slane %v2318_v51, 1  ;;  %v1474_v17 = vsel %vm543_vm2, %v1471_v16, %v1473_v38  ;;  %v2317_v32 = vld [vmem:[%s3754_s1 + $0x3] ss:$8 sm:$0x3] }
 0x44d   : > { %3875 = vst [vmem:[#allocation3_spill] sm:$0xff] %v3407_v33  ;;  %1680 = vmatpush.msra.mxu3 %v3407_v33  ;;  %1740 = vmatpush.msrb.mxu2 %v3409_v44  ;;  %v3441_v18 = vmul.f32 %v1494_v60, %v1490_v52  ;;  %v3443_v33 = vmul.f32 %v1495_v26, %v1491_v31  ;;  %v1461_v31 = vperm.slane %v2317_v32, 1 }
 0x44e   : > { %3876 = vst [vmem:[#allocation4_spill] sm:$0xff] %v3409_v44  ;;  %v1475_v44 = vsel %vm543_vm2, %v1473_v38, %v1471_v16  ;;  %v1421_v16 = vpop.permute.xlu2 %1420  ;;  %v2315_v38 = vld [vmem:[%s3754_s1 + $0x1] ss:$8 sm:$0x3]  ;;  %v1441_v26 = vsel %vm483_vm4, %v1439_v3, %v1437_v36 }
 0x451   : > { %v1503_v25 = vpop.permute.xlu1 %1502  ;;  %v1423_v60 = vpop.permute.xlu0 %1422 }
 0x452   : > { %v1506_v28 = vsel %vm599_vm0, %v1503_v25, %v1505_v50  ;;  %v1507_v55 = vsel %vm599_vm0, %v1505_v50, %v1503_v25  ;;  %v1460_v50 = vperm.slane %v2317_v32, 0 }
 0x453   : > { %v3430_v13 = vmul.f32 %v1510_v6, %v1506_v28  ;;  %v3432_v34 = vmul.f32 %v1511_v1, %v1507_v55  ;;  %v2316_v55 = vld [vmem:[%s3754_s1 + $0x2] ss:$8 sm:$0x3]  ;;  %v3450_v28 = vmul.f32 %v1478_v19, %v1474_v17  ;;  %v3452_v6 = vmul.f32 %v1479_v4, %v1475_v44 }
 0x454   : > { %v1444_v1 = vperm.slane %v2316_v55, 0  ;;  %v1445_v51 = vperm.slane %v2316_v55, 1  ;;  %v1440_v44 = vsel %vm483_vm4, %v1437_v36, %v1439_v3  ;;  %v1428_v19 = vperm.slane %v2315_v38, 0  ;;  %v1410_v3 = vld [vmem:[%s3754_s1] ss:$8 sm:$0x3] }
 0x455   : > { %1681 = vmatpush.msra.mxu3 %v3430_v13  ;;  %1741 = vmatpush.msrb.mxu2 %v3432_v34  ;;  %3877 = vst [vmem:[#allocation5_spill] sm:$0xff] %v3452_v6  ;;  %v1429_v17 = vperm.slane %v2315_v38, 1  ;;  %v1425_v36 = vsel %vm455_vm7, %v1423_v60, %v1421_v16 }
 0x457   : > { %1682 = vmatpush.msra.mxu3 %v3441_v18  ;;  %1742 = vmatpush.msrb.mxu2 %v3443_v33 }
 0x459   : > { %1683 = vmatpush.msra.mxu3 %v3450_v28  ;;  %1743 = vmatpush.msrb.mxu2 %v3452_v6  ;;  %v1453_v4 = vpop.permute.xlu1 %1452  ;;  %v1424_v6 = vsel %vm455_vm7, %v1421_v16, %v1423_v60  ;;  %v1412_v16 = vperm.slane %v1410_v3, 0  ;;  %v1413_v60 = vperm.slane %v1410_v3, 1 }
 0x45a   : > { %v1456_v25 = vsel %vm511_vm3, %v1453_v4, %v1455_v42  ;;  %v1457_v52 = vsel %vm511_vm3, %v1455_v42, %v1453_v4  ;;  %v3482_v42 = vmul.f32 %v1444_v1, %v1441_v26  ;;  %v3490_v38 = vmul.f32 %v1429_v17, %v1424_v6  ;;  %v1407_v4 = vpop.permute.xlu2 %1406  ;;  %v1626_v17 = vld [vmem:[%s3761_s8 + $0x10] sm:$0xff] }
 0x45b   : > { %v3469_v32 = vmul.f32 %v1460_v50, %v1457_v52  ;;  %v3471_v55 = vmul.f32 %v1461_v31, %v1456_v25  ;;  %1684 = vmatpush.msra.mxu3 %v3369_v48  ;;  %1744 = vmatpush.msrb.mxu2 %v3361_v15  ;;  %v3484_v50 = vmul.f32 %v1445_v51, %v1440_v44  ;;  %v3878_v25 = vld [vmem:[#allocation29_spill] sm:$0xff]  ;;  %v3879_v52 = vld [vmem:[#allocation30_spill] sm:$0xff] }
 0x45c   : > { %v3488_v31 = vmul.f32 %v1428_v19, %v1425_v36  ;;  %v3880_v19 = vld [vmem:[#allocation31_spill] sm:$0xff]  ;;  %v3881_v36 = vld [vmem:[#allocation32_spill] sm:$0xff] }
 0x45d   : > { %1685 = vmatpush.msra.mxu3 %v3469_v32  ;;  %1745 = vmatpush.msrb.mxu2 %v3471_v55 }
 0x45f   : > { %1686 = vmatpush.msra.mxu3 %v3482_v42  ;;  %1746 = vmatpush.msrb.mxu2 %v3484_v50 }
 0x461   : > { %1687 = vmatpush.msra.mxu3 %v3488_v31  ;;  %1747 = vmatpush.msrb.mxu2 %v3490_v38  ;;  %v1405_v1 = vpop.permute.xlu1 %1404 }
 0x462   : > { %v1408_v51 = vsel %vm428_vm8, %v1405_v1, %v1407_v4  ;;  %v1409_v44 = vsel %vm428_vm8, %v1407_v4, %v1405_v1  ;;  %v2324_v1 = vld [vmem:[%s3754_s1 + $0x1] ss:$8 sm:$0x3] }
 0x463   : > { %v3500_v6 = vmul.f32 %v1412_v16, %v1409_v44  ;;  %v3502_v26 = vmul.f32 %v1413_v60, %v1408_v51  ;;  %v1769_v51 = vld [vmem:[%s3754_s1] ss:$8 sm:$0x3]  ;;  %v1787_v44 = vperm.slane %v2324_v1, 0 }
 0x465   : > { %1688 = vmatpush.msra.mxu3 %v3500_v6  ;;  %1748 = vmatpush.msrb.mxu2 %v3502_v26 }
 0x467   : > { %1689 = vmatpush.msra.mxu3 %v3244_v63  ;;  %1749 = vmatpush.msrb.mxu2 %v3878_v25 }
 0x469   : > { %1690 = vmatpush.msra.mxu3 %v3252_v46  ;;  %1750 = vmatpush.msrb.mxu2 %v3879_v52 }
 0x46b   : > { %1691 = vmatpush.msra.mxu3 %v3259_v12  ;;  %1751 = vmatpush.msrb.mxu2 %v3880_v19 }
 0x46d   : > { %1692 = vmatpush.msra.mxu3 %v3264_v58  ;;  %1752 = vmatpush.msrb.mxu2 %v3881_v36 }
 0x46e   : > { %2322 = vmatmul.msk.f32.vlgmr.msra.gmra.mxu3 %vm1633_vm9, %v1626_v17  ;;  %2323 = vmatmul.msk.f32.vlgmr.msrb.gmra.mxu2 %vm1633_vm9, %v1626_v17  ;;  %v1788_v17 = vperm.slane %v2324_v1, 1 }
 0x46f   : > { %2028 = vmatpush.msrb.mxu3 %v2579_v20  ;;  %v3552_v20 = vld [vmem:[%s3763_s10] sm:$0xff] }
 0x471   : > { %2029 = vmatpush.msrb.mxu3 %v2585_v22  ;;  %v2002_v22 = vld [vmem:[%s3763_s10 + $0x8] sm:$0xff] }
 0x472   : > { %2067 = vmatmul.f32.vlgmr.msra.gmra.mxu0 %v2002_v22 }
 0x473   : > { %2030 = vmatpush.msrb.mxu3 %v2589_v23  ;;  %v1654_v23 = vpop.f32.mrf.mxu1 }
 0x475   : > { %2031 = vmatpush.msrb.mxu3 %v2603_v27  ;;  %v1714_v27 = vpop.f32.mrf.mxu0 }
 0x477   : > { %2032 = vmatpush.msrb.mxu3 %v2628_v35  ;;  %v3561_v35 = vld [vmem:[%s3763_s10 + $0x20] sm:$0xff] }
 0x479   : > { %2033 = vmatpush.msrb.mxu3 %v2635_v37  ;;  %v1631_v37 = vpop.permute.xlu0 %1630 }
 0x47b   : > { %2034 = vmatpush.msrb.mxu3 %v3298_v29 }
 0x47d   : > { %2035 = vmatpush.msrb.mxu3 %v3304_v14 }
 0x47f   : > { %2036 = vmatpush.msrb.mxu3 %v2655_v43  ;;  %v1674_v43 = vpop.f32.mrf.mxu2 }
 0x481   : > { %2037 = vmatpush.msrb.mxu3 %v3859_v40 }
 0x483   : > { %2038 = vmatpush.msrb.mxu3 %v3861_v9 }
 0x485   : > { %2039 = vmatpush.msrb.mxu3 %v3863_v59  ;;  %v2010_v59 = vld [vmem:[%s3764_s11 + $0x8] sm:$0xff] }
 0x487   : > { %2040 = vmatpush.msrb.mxu3 %v3865_v8  ;;  %v2009_v8 = vld [vmem:[%s3764_s11] sm:$0xff] }
 0x489   : > { %2041 = vmatpush.msrb.mxu3 %v3866_v62 }
 0x48b   : > { %2042 = vmatpush.msrb.mxu3 %v3867_v47  ;;  %v2325_v47 = vld [vmem:[%s3754_s1 + $0x2] ss:$8 sm:$0x3] }
 0x48d   : > { %2043 = vmatpush.msrb.mxu3 %v3868_v24  ;;  %v1803_v24 = vperm.slane %v2325_v47, 0 }
 0x48e   : > { %2044 = vmatmul.f32.vlgmr.msrb.gmra.mxu3 %v3552_v20 }
 0x48f   : > { %2143 = vmatpush.msra.mxu3 %v3869_v0 }
 0x491   : > { %2144 = vmatpush.msra.mxu3 %v3139_v53  ;;  %v1655_v53 = vadd.f32 %v1654_v23, %v1631_v37  ;;  %v1772_v23 = vperm.slane %v1769_v51, 1 }
 0x493   : > { %2145 = vmatpush.msra.mxu3 %v3150_v41 }
 0x495   : > { %2146 = vmatpush.msra.mxu3 %v3161_v10 }
 0x496   : > { %2047 = vmatmul.f32.gmra.mxu3 %v3561_v35 }
 0x497   : > { %2147 = vmatpush.msra.mxu3 %v3177_v2 }
 0x499   : > { %2148 = vmatpush.msra.mxu3 %v2931_v49  ;;  %v1675_v49 = vadd.f32 %v1674_v43, %v1655_v53 }
 0x49b   : > { %2149 = vmatpush.msra.mxu3 %v2954_v7 }
 0x49d   : > { %2150 = vmatpush.msra.mxu3 %v3870_v5  ;;  %v1804_v5 = vperm.slane %v2325_v47, 1 }
 0x49f   : > { %2151 = vmatpush.msra.mxu3 %v3871_v39 }
 0x4a1   : > { %2152 = vmatpush.msra.mxu3 %v3872_v21 }
 0x4a3   : > { %2153 = vmatpush.msra.mxu3 %v3873_v54 }
 0x4a5   : > { %2154 = vmatpush.msra.mxu3 %v3012_v56  ;;  %v2006_v56 = vld [vmem:[%s3763_s10 + $0x28] sm:$0xff] }
 0x4a6   : > { %2070 = vmatmul.f32.gmra.mxu0 %v2006_v56 }
 0x4a7   : > { %2155 = vmatpush.msra.mxu3 %v3018_v57 }
 0x4a9   : > { %2156 = vmatpush.msra.mxu3 %v3033_v45 }
 0x4ab   : > { %2157 = vmatpush.msra.mxu3 %v2700_v61  ;;  %v1715_v61 = vadd.f32 %v1714_v27, %v1631_v37 }
 0x4ad   : > { %2158 = vmatpush.msra.mxu3 %v2723_v30  ;;  %v1734_v30 = vpop.f32.mrf.mxu1 }
 0x4ae   : > { %v1735_v7 = vadd.f32 %v1734_v30, %v1715_v61  ;;  %2159 = vmatmul.f32.vlgmr.msra.gmra.mxu3 %v2002_v22  ;;  %v1771_v22 = vperm.slane %v1769_v51, 0 }
 0x4b6   : > { %2162 = vmatmul.f32.gmra.mxu3 %v2006_v56  ;;  %v3633_v56 = vld [vmem:[%s3754_s1 + $0x10] ss:$8 sm:$0x3] }
 0x4f1   : > { %v1694_v57 = vpop.f32.mrf.mxu3  ;;  %v1754_v45 = vpop.f32.mrf.mxu2 }
 0x4f2   : > { %v1695_v41 = vadd.f32 %v1694_v57, %v1675_v49  ;;  %v1755_v10 = vadd.f32 %v1754_v45, %v1735_v7 }
 0x4f4   : > { %vm1757_vm10 = vcmp.ge.f32.partialorder %v1695_v41, 0.0  ;;  %v1759_v2 = vmul.f32 0.2, %v1695_v41  ;;  %vm1758_vm11 = vcmp.ge.f32.partialorder %v1755_v10, 0.0  ;;  %v1760_v40 = vmul.f32 0.2, %v1755_v10 }
 0x4f6   : > { %v3567_v9 = vsel %vm1757_vm10, %v1695_v41, %v1759_v2  ;;  %v3569_v0 = vsel %vm1758_vm11, %v1755_v10, %v1760_v40  ;;  %v1885_v10 = vperm.slane %v3633_v56, 0 }
 0x4f7   : > { %1779 = vrot.lane.b32.xlu0 %v3567_v9, %s2377_s15  ;;  %1795 = vrot.lane.b32.xlu1 %v3567_v9, %s2375_s13 }
 0x4f8   : > { %1797 = vrot.lane.b32.xlu2 %v3569_v0, %s2375_s13 }
 0x4ff   : > { %1765 = vrot.lane.b32.xlu0 %v3569_v0, %s3874_s25  ;;  %1781 = vrot.lane.b32.xlu1 %v3569_v0, %s2377_s15 }
 0x500   : > { %1763 = vrot.lane.b32.xlu2 %v3567_v9, %s3874_s25 }
 0x507   : > { %1861 = vrot.lane.b32.xlu0 %v3567_v9, %s2371_s27  ;;  %1877 = vrot.lane.b32.xlu1 %v3567_v9, %s2376_s14 }
 0x508   : > { %1879 = vrot.lane.b32.xlu2 %v3569_v0, %s2376_s14 }
 0x50f   : > { %1847 = vrot.lane.b32.xlu0 %v3569_v0, %s2372_s28  ;;  %1863 = vrot.lane.b32.xlu1 %v3569_v0, %s2371_s27 }
 0x510   : > { %1845 = vrot.lane.b32.xlu2 %v3567_v9, %s2372_s28 }
 0x517   : > { %1811 = vrot.lane.b32.xlu0 %v3567_v9, %s2374_s30  ;;  %1829 = vrot.lane.b32.xlu1 %v3567_v9, %s2373_s29 }
 0x518   : > { %1831 = vrot.lane.b32.xlu2 %v3569_v0, %s2373_s29 }
 0x51f   : > { %2018 = vperm.xlu0 %2358, %v2010_v59   ;;  %1813 = vrot.lane.b32.xlu1 %v3569_v0, %s2374_s30  ;;  %v3882_v59 = vld [vmem:[#allocation3_spill] sm:$0xff] }
 0x520   : > { %2013 = vperm.xlu2 %2356, %v2009_v8   ;;  %v3883_v8 = vld [vmem:[#allocation4_spill] sm:$0xff] }
 0x552   : > { %v1798_v62 = vpop.permute.xlu2 %1797 }
 0x55a   : > { %v1764_v16 = vpop.permute.xlu2 %1763 }
 0x562   : > { %v1880_v57 = vpop.permute.xlu2 %1879 }
 0x569   : > { %v1780_v39 = vpop.permute.xlu0 %1779  ;;  %v1796_v21 = vpop.permute.xlu1 %1795 }
 0x56a   : > { %v1799_v54 = vsel %vm483_vm4, %v1796_v21, %v1798_v62  ;;  %v1800_v3 = vsel %vm483_vm4, %v1798_v62, %v1796_v21  ;;  %v3884_v21 = vld [vmem:[#allocation5_spill] sm:$0xff] }
 0x56b   : > { %v1807_v60 = vmul.f32 %v1803_v24, %v1800_v3  ;;  %v1808_v4 = vmul.f32 %v1804_v5, %v1799_v54  ;;  %v2329_v24 = vld [vmem:[%s3754_s1 + $0x7] ss:$8 sm:$0x3]  ;;  %v3650_v5 = vld [vmem:[%s3754_s1 + $0x6] ss:$8 sm:$0x3] }
 0x56d   : > { %2074 = vmatpush.msra.mxu2 %v1807_v60  ;;  %2166 = vmatpush.msrb.mxu0 %v1808_v4 }
 0x571   : > { %v1766_v27 = vpop.permute.xlu0 %1765  ;;  %v1782_v37 = vpop.permute.xlu1 %1781 }
 0x572   : > { %v1767_v43 = vsel %vm428_vm8, %v1764_v16, %v1766_v27  ;;  %v1768_v53 = vsel %vm428_vm8, %v1766_v27, %v1764_v16  ;;  %v1783_v61 = vsel %vm455_vm7, %v1780_v39, %v1782_v37  ;;  %v1784_v30 = vsel %vm455_vm7, %v1782_v37, %v1780_v39  ;;  %v1846_v39 = vpop.permute.xlu2 %1845  ;;  %v2007_v37 = vld [vmem:[%s3763_s10 + $0x30] sm:$0xff] }
 0x573   : > { %v1791_v49 = vmul.f32 %v1787_v44, %v1784_v30  ;;  %v1792_v7 = vmul.f32 %v1788_v17, %v1783_v61  ;;  %v1775_v45 = vmul.f32 %v1771_v22, %v1768_v53  ;;  %v1776_v41 = vmul.f32 %v1772_v23, %v1767_v43  ;;  %v3885_v23 = vld [vmem:[#allocation6_spill] sm:$0xff]  ;;  %v3886_v53 = vld [vmem:[#allocation7_spill] sm:$0xff]  ;;  %v3887_v61 = vld [vmem:[#allocation8_spill] sm:$0xff] }
 0x575   : > { %2075 = vmatpush.msra.mxu2 %v1791_v49  ;;  %2167 = vmatpush.msrb.mxu0 %v1792_v7  ;;  %v3888_v49 = vld [vmem:[#allocation9_spill] sm:$0xff]  ;;  %v2008_v7 = vld [vmem:[%s3763_s10 + $0x38] sm:$0xff] }
 0x577   : > { %2076 = vmatpush.msra.mxu2 %v1775_v45  ;;  %2168 = vmatpush.msrb.mxu0 %v1776_v41  ;;  %v3892_v45 = vld [vmem:[#allocation34_spill] sm:$0xff]  ;;  %v3894_v41 = vld [vmem:[#allocation16_spill] sm:$0xff] }
 0x579   : > { %v1862_v2 = vpop.permute.xlu0 %1861  ;;  %v1878_v40 = vpop.permute.xlu1 %1877  ;;  %2077 = vmatpush.msra.mxu2 %v3882_v59  ;;  %2169 = vmatpush.msrb.mxu0 %v3883_v8  ;;  %v3898_v59 = vld [vmem:[#allocation21_spill] sm:$0xff]  ;;  %v3899_v8 = vld [vmem:[#allocation22_spill] sm:$0xff] }
 0x57a   : > { %v1881_v62 = vsel %vm627_vm5, %v1878_v40, %v1880_v57 }
 0x57b   : > { %v1889_v47 = vmul.f32 %v1885_v10, %v1881_v62  ;;  %2078 = vmatpush.msra.mxu2 %v3430_v13  ;;  %2170 = vmatpush.msrb.mxu0 %v3432_v34  ;;  %v1869_v13 = vperm.slane %v2329_v24, 0  ;;  %v1853_v34 = vperm.slane %v3650_v5, 0  ;;  %v3895_v10 = vld [vmem:[#allocation17_spill] sm:$0xff]  ;;  %v3900_v62 = vld [vmem:[#allocation23_spill] sm:$0xff] }
 0x57d   : > { %2079 = vmatpush.msra.mxu2 %v3441_v18  ;;  %2107 = vmatpush.msrb.mxu1 %v1889_v47  ;;  %v2045_v47 = vpop.f32.mrf.mxu3 }
 0x57e   : > { %2171 = vmatpush.msrb.mxu0 %v3443_v33 }
 0x57f   : > { %2080 = vmatpush.msra.mxu2 %v3450_v28  ;;  %v2327_v28 = vld [vmem:[%s3754_s1 + $0x5] ss:$8 sm:$0x3] }
 0x580   : > { %2172 = vmatpush.msrb.mxu0 %v3884_v21  ;;  %v1838_v44 = vperm.slane %v2327_v28, 1 }
 0x581   : > { %v1848_v54 = vpop.permute.xlu0 %1847  ;;  %v1864_v3 = vpop.permute.xlu1 %1863  ;;  %2081 = vmatpush.msra.mxu2 %v3369_v48  ;;  %v1837_v48 = vperm.slane %v2327_v28, 0 }
 0x582   : > { %v1849_v33 = vsel %vm571_vm1, %v1846_v39, %v1848_v54  ;;  %v1865_v18 = vsel %vm599_vm0, %v1862_v2, %v1864_v3  ;;  %2173 = vmatpush.msrb.mxu0 %v3361_v15  ;;  %v1832_v15 = vpop.permute.xlu2 %1831 }
 0x583   : > { %v1873_v16 = vmul.f32 %v1869_v13, %v1865_v18  ;;  %2082 = vmatpush.msra.mxu2 %v3469_v32  ;;  %v1857_v60 = vmul.f32 %v1853_v34, %v1849_v33 }
 0x584   : > { %2174 = vmatpush.msrb.mxu0 %v3471_v55 }
 0x585   : > { %2083 = vmatpush.msra.mxu2 %v3482_v42  ;;  %2108 = vmatpush.msrb.mxu1 %v1873_v16  ;;  %v2326_v42 = vld [vmem:[%s3754_s1 + $0x3] ss:$8 sm:$0x3]  ;;  %v2048_v21 = vpop.f32.mrf.mxu3 }
 0x586   : > { %2175 = vmatpush.msrb.mxu0 %v3484_v50  ;;  %v1886_v50 = vperm.slane %v3633_v56, 1  ;;  %v1820_v27 = vperm.slane %v2326_v42, 1  ;;  %v3889_v56 = vld [vmem:[#allocation11_spill] sm:$0xff] }
 0x587   : > { %2084 = vmatpush.msra.mxu2 %v3488_v31  ;;  %2109 = vmatpush.msrb.mxu1 %v1857_v60  ;;  %v1882_v31 = vsel %vm627_vm5, %v1880_v57, %v1878_v40  ;;  %v3891_v57 = vld [vmem:[#allocation33_spill] sm:$0xff]  ;;  %v3897_v40 = vld [vmem:[#allocation20_spill] sm:$0xff] }
 0x588   : > { %2176 = vmatpush.msrb.mxu0 %v3490_v38  ;;  %v1870_v38 = vperm.slane %v2329_v24, 1 }
 0x589   : > { %v1830_v32 = vpop.permute.xlu1 %1829  ;;  %2085 = vmatpush.msra.mxu2 %v3500_v6  ;;  %v2003_v6 = vld [vmem:[%s3763_s10 + $0x10] sm:$0xff]  ;;  %v1812_v1 = vpop.permute.xlu0 %1811 }
 0x58a   : > { %v1833_v55 = vsel %vm543_vm2, %v1830_v32, %v1832_v15  ;;  %2177 = vmatpush.msrb.mxu0 %v3502_v26  ;;  %v1866_v26 = vsel %vm599_vm0, %v1864_v3, %v1862_v2  ;;  %vm2021_vm0 = vcmask 392192   ;;  %v3896_v2 = vld [vmem:[#allocation18_spill] sm:$0xff]  ;;  %v2014_v24 = vpop.permute.xlu2 %2013 }
 0x58b   : > { %v1841_v4 = vmul.f32 %v1837_v48, %v1833_v55  ;;  %2086 = vmatpush.msra.mxu2 %v3244_v63  ;;  %v1819_v63 = vperm.slane %v2326_v42, 0  ;;  %v1874_v51 = vmul.f32 %v1870_v38, %v1866_v26 }
 0x58c   : > { %2178 = vmatpush.msrb.mxu0 %v3878_v25  ;;  %v1854_v25 = vperm.slane %v3650_v5, 1  ;;  %v2046_v5 = vadd.f32 %v2045_v47, %v2014_v24 }
 0x58d   : > { %2087 = vmatpush.msra.mxu2 %v3252_v46  ;;  %2110 = vmatpush.msrb.mxu1 %v1841_v4  ;;  %v1890_v46 = vmul.f32 %v1886_v50, %v1882_v31  ;;  %v2160_v50 = vpop.f32.mrf.mxu3 }
 0x58e   : > { %2179 = vmatpush.msrb.mxu0 %v3879_v52 }
 0x58f   : > { %2088 = vmatpush.msra.mxu2 %v3259_v12  ;;  %2111 = vmatpush.msrb.mxu1 %v3567_v9  ;;  %v1850_v12 = vsel %vm571_vm1, %v1848_v54, %v1846_v39  ;;  %v2068_v39 = vpop.f32.mrf.mxu0 }
 0x590   : > { %2180 = vmatpush.msrb.mxu0 %v3880_v19  ;;  %v1834_v19 = vsel %vm543_vm2, %v1832_v15, %v1830_v32  ;;  %v1858_v22 = vmul.f32 %v1854_v25, %v1850_v12  ;;  %v2069_v13 = vadd.f32 %v2068_v39, %v2046_v5 }
 0x591   : > { %v1814_v52 = vpop.permute.xlu1 %1813  ;;  %2089 = vmatpush.msra.mxu2 %v3264_v58  ;;  %v2004_v58 = vld [vmem:[%s3763_s10 + $0x18] sm:$0xff]  ;;  %v2019_v54 = vpop.permute.xlu0 %2018 }
 0x592   : > { %v1816_v9 = vsel %vm511_vm3, %v1814_v52, %v1812_v1  ;;  %2181 = vmatpush.msrb.mxu0 %v3881_v36  ;;  %2090 = vmatmul.f32.vlgmr.msra.gmra.mxu2 %v2003_v6  ;;  %v1842_v36 = vmul.f32 %v1838_v44, %v1834_v19  ;;  %v1815_v43 = vsel %vm511_vm3, %v1812_v1, %v1814_v52 }
 0x593   : > { %v1823_v17 = vmul.f32 %v1819_v63, %v1816_v9  ;;  %2199 = vmatpush.msrb.mxu2 %v1890_v46  ;;  %2182 = vmatmul.f32.vlgmr.msrb.gmra.mxu0 %v2003_v6  ;;  %v1824_v30 = vmul.f32 %v1820_v27, %v1815_v43  ;;  %v2049_v18 = vadd.f32 %v2048_v21, %v2019_v54 }
 0x595   : > { %2200 = vmatpush.msrb.mxu2 %v1874_v51  ;;  %2112 = vmatpush.msrb.mxu1 %v1823_v17  ;;  %v2163_v1 = vpop.f32.mrf.mxu3 }
 0x596   : > { %2331 = vmatmul.msk.f32.vlgmr.msrb.gmra.mxu1 %vm2021_vm0, %v2004_v58 }
 0x597   : > { %2120 = vmatpush.msra.mxu1 %v3885_v23  ;;  %2201 = vmatpush.msrb.mxu2 %v1858_v22  ;;  %v2071_v28 = vpop.f32.mrf.mxu0 }
 0x599   : > { %2121 = vmatpush.msra.mxu1 %v3886_v53  ;;  %2202 = vmatpush.msrb.mxu2 %v1842_v36 }
 0x59a   : > { %2093 = vmatmul.f32.gmra.mxu2 %v2007_v37 }
 0x59b   : > { %2122 = vmatpush.msra.mxu1 %v3887_v61  ;;  %2203 = vmatpush.msrb.mxu2 %v3569_v0  ;;  %v3893_v0 = vld [vmem:[#allocation14_spill] sm:$0xff] }
 0x59c   : > { %2185 = vmatmul.f32.gmra.mxu0 %v2007_v37 }
 0x59d   : > { %2123 = vmatpush.msra.mxu1 %v3888_v49  ;;  %2204 = vmatpush.msrb.mxu2 %v1824_v30 }
 0x59e   : > { %2332 = vmatmul.msk.f32.gmra.mxu1 %vm2021_vm0, %v2008_v7 }
 0x59f   : > { %2124 = vmatpush.msra.mxu1 %v3889_v56 }
 0x5a1   : > { %2125 = vmatpush.msra.mxu1 %v3890_v11 }
 0x5a2   : > { %2333 = vmatmul.msk.f32.vlgmr.msrb.gmra.mxu2 %vm2021_vm0, %v2004_v58 }
 0x5a3   : > { %2126 = vmatpush.msra.mxu1 %v3891_v57 }
 0x5a5   : > { %2127 = vmatpush.msra.mxu1 %v3892_v45 }
 0x5a7   : > { %2128 = vmatpush.msra.mxu1 %v3893_v0 }
 0x5a9   : > { %2129 = vmatpush.msra.mxu1 %v3894_v41 }
 0x5aa   : > { %2334 = vmatmul.msk.f32.gmra.mxu2 %vm2021_vm0, %v2008_v7 }
 0x5ab   : > { %2130 = vmatpush.msra.mxu1 %v3895_v10 }
 0x5ad   : > { %2131 = vmatpush.msra.mxu1 %v3896_v2 }
 0x5af   : > { %2132 = vmatpush.msra.mxu1 %v3897_v40 }
 0x5b1   : > { %2133 = vmatpush.msra.mxu1 %v3898_v59 }
 0x5b3   : > { %2134 = vmatpush.msra.mxu1 %v3899_v8 }
 0x5b5   : > { %2135 = vmatpush.msra.mxu1 %v3900_v62 }
 0x5b6   : > { %2136 = vmatmul.f32.vlgmr.msra.gmra.mxu1 %v3552_v20  ;;  %v2072_v20 = vadd.f32 %v2071_v28, %v2049_v18 }
 0x5be   : > { %2139 = vmatmul.f32.gmra.mxu1 %v3561_v35 }
 0x610   : > { %v2183_v38 = vpop.f32.mrf.mxu0 }
 0x613   : > { %v2114_v34 = vpop.f32.mrf.mxu1 }
 0x615   : > { %v2091_v3 = vpop.f32.mrf.mxu2 }
 0x616   : > { %v2092_v33 = vadd.f32 %v2091_v3, %v2069_v13 }
 0x618   : > { %v2115_v16 = vadd.f32 %v2114_v34, %v2092_v33 }
 0x619   : > { %v2186_v9 = vpop.f32.mrf.mxu0 }
 0x61a   : > { %v2212_v60 = vmul.f32 0.2, %v2115_v16 }
 0x61b   : > { %v2117_v15 = vpop.f32.mrf.mxu1 }
 0x61c   : > { %v2216_v35 = vadd.f32 %v3304_v14, %v2212_v60 }
 0x61d   : > { %v2094_v48 = vpop.f32.mrf.mxu2 }
 0x61e   : > { %2220 = vst [vmem:[%s3740_s18] sm:$0xff] %v2216_v35  ;;  %v2095_v32 = vadd.f32 %v2094_v48, %v2072_v20 }
 0x620   : > { %v2118_v55 = vadd.f32 %v2117_v15, %v2095_v32 }
 0x622   : > { %v2214_v4 = vmul.f32 0.2, %v2118_v55 }
 0x624   : > { %v2218_v42 = vadd.f32 %v3298_v29, %v2214_v4 }
 0x625   : > { %v2206_v6 = vpop.f32.mrf.mxu2 }
 0x626   : > { %2222 = vst [vmem:[%s3740_s18 + $0x10] sm:$0xff] %v2218_v42 }
 0x62d   : > { %v2209_v29 = vpop.f32.mrf.mxu2 }
 0x633   : > { %v2137_v31 = vpop.f32.mrf.mxu1 }
 0x634   : > { %v2138_v63 = vadd.f32 %v2137_v31, %v2014_v24 }
 0x636   : > { %v2161_v26 = vadd.f32 %v2160_v50, %v2138_v63 }
 0x638   : > { %v2184_v46 = vadd.f32 %v2183_v38, %v2161_v26 }
 0x63a   : > { %v2207_v25 = vadd.f32 %v2206_v6, %v2184_v46 }
 0x63b   : > { %v2140_v14 = vpop.f32.mrf.mxu1 }
 0x63c   : > { %v2213_v52 = vmul.f32 0.2, %v2207_v25  ;;  %v2141_v12 = vadd.f32 %v2140_v14, %v2019_v54 }
 0x63e   : > { %v2217_v51 = vadd.f32 %v3892_v45, %v2213_v52  ;;  %v2164_v44 = vadd.f32 %v2163_v1, %v2141_v12 }
 0x640   : > { %2221 = vst [vmem:[%s3740_s18 + $0x8] sm:$0xff] %v2217_v51  ;;  %v2187_v17 = vadd.f32 %v2186_v9, %v2164_v44 }
 0x642   : > { %v2210_v19 = vadd.f32 %v2209_v29, %v2187_v17 }
 0x644   : > { %v2215_v58 = vmul.f32 0.2, %v2210_v19 }
 0x646   : > { %v2219_v22 = vadd.f32 %v3891_v57, %v2215_v58 }
 0x648   : > { %2223 = vst [vmem:[%s3740_s18 + $0x18] sm:$0xff] %v2219_v22 }
 0x649 PF: > { %s22_s21 = sadd.s32 1, %s2369_s21  }
 0x64a   : > { %p19_p4 = scmp.ge.s32.totalorder %s22_s21, 4  }
 0x64c   :  { %21 = sbr.rel (!%p19_p4) target bundleno = 1 (0x1), region = 105 }

</bundles_post_ra>
